<compile_context>
chip_gen: v7x
topology: tpu7x:2x2x1
jax: 0.10.0
libtpu: 0.0.40
codegen_flags: <defaults>
</compile_context>

<pallas_src>
import math
import functools

import jax
import jax.numpy as jnp
from jax.experimental import pallas as pl
from jax.experimental.pallas import tpu as pltpu

# ---------------- model hyper-parameters (small synthetic sizes) -------------
B = 2            # batch
NPRATIO = 4      # candidate news per user
HIS_NUM = 8      # clicked-history length
WORD_NUM = 8     # words per news title
VOCAB = 64       # glove vocab size
EMB_DIM = 32     # word embedding dim
NUM_HEADS = 4
D_K = 8          # per-head dim  (news_dim = NUM_HEADS * D_K = 32)
NEWS_DIM = NUM_HEADS * D_K
QUERY_DIM = 16   # additive-attention query dim

TILE_ITEMS = 8   # items per grid step (sublane-multiple; whole toy problem in <=3 steps)


# ---------------- Pallas kernel -----------------------------------------------
def encoder_kernel(x_ref, wqkv_ref, att_ref, out_ref, *, num_heads, d_k):
    """Encode a batch of TN items: MH self-attn over L positions + additive pool.

    x_ref    : [TN, L, D]       sequence of word embeddings / news vectors
    wqkv_ref : [D, 3*HD]        fused Q|K|V projection
    att_ref  : [HD+2, Q]        rows 0..HD-1 = att_fc1.W, row HD = att_fc1.b,
                                row HD+1 = att_fc2.W^T (fc2 bias folded away)
    out_ref  : [TN, HD]         pooled vectors
    """
    TN, L, D = x_ref.shape
    HD = num_heads * d_k

    x2 = x_ref[...].reshape(TN * L, D)                                    # [TN*L, D]
    qkv = jnp.dot(x2, wqkv_ref[...], preferred_element_type=jnp.float32)  # [TN*L, 3HD]

    scale = 1.0 / math.sqrt(d_k)
    ctx_heads = []
    for h in range(num_heads):                 # 4-way static unroll over heads
        q_h = qkv[:, h * d_k:(h + 1) * d_k].reshape(TN, L, d_k)
        k_h = qkv[:, HD + h * d_k: HD + (h + 1) * d_k].reshape(TN, L, d_k)
        v_h = qkv[:, 2 * HD + h * d_k: 2 * HD + (h + 1) * d_k].reshape(TN, L, d_k)

        s = jnp.einsum("bqd,bkd->bqk", q_h, k_h,
                       preferred_element_type=jnp.float32) * scale        # [TN, L, L]
        s = s - jnp.max(s, axis=-1, keepdims=True)
        p = jnp.exp(s)
        inv = pl.reciprocal(jnp.sum(p, axis=-1, keepdims=True), approx=True)
        a = p * inv
        ctx_heads.append(jnp.einsum("bqk,bkd->bqd", a, v_h,
                                    preferred_element_type=jnp.float32))  # [TN, L, dk]
    ctx3 = jnp.concatenate(ctx_heads, axis=-1)                            # [TN, L, HD]
    ctx2 = ctx3.reshape(TN * L, HD)

    # additive attention pooling (matches MIND AdditiveAttention)
    a1w = att_ref[0:HD, :]                 # [HD, Q]
    a1b = att_ref[HD:HD + 1, :]            # [1, Q]
    a2w = att_ref[HD + 1:HD + 2, :]        # [1, Q]  (= att_fc2.weight^T)
    e = jnp.tanh(jnp.dot(ctx2, a1w, preferred_element_type=jnp.float32) + a1b)
    logits = jnp.sum(e * a2w, axis=-1, keepdims=True).reshape(TN, L, 1)   # [TN, L, 1]
    logits = logits - jnp.max(logits, axis=1, keepdims=True)              # stability
    alpha = jnp.exp(logits)
    inv_den = pl.reciprocal(jnp.sum(alpha, axis=1, keepdims=True) + 1e-8,
                            approx=True)
    alpha = alpha * inv_den                                               # [TN, L, 1]
    out_ref[...] = jnp.sum(alpha * ctx3, axis=1)                          # [TN, HD]


# ---------------- wrappers ----------------------------------------------------
def pack_encoder_params(p):
    """(wq, wk, wv, a1w, a1b, a2w, a2b) -> (wqkv [D,3HD], att [HD+2,Q])."""
    wq, wk, wv, a1w, a1b, a2w, a2b = p
    wqkv = jnp.concatenate([wq, wk, wv], axis=1)
    # a2b cancels in the additive-attention softmax (up to the +1e-8 term),
    # so it is folded away instead of shipping a (1,1) VMEM block.
    att = jnp.concatenate([a1w, a1b, a2w.T], axis=0)
    return wqkv, att


def run_encoder(x, packed_params, *, num_heads, d_k, tile_items=TILE_ITEMS):
    """x: [N, L, D]  ->  [N, num_heads*d_k]"""
    wqkv, att = packed_params
    N, L, D = x.shape
    HD = num_heads * d_k
    Q = att.shape[1]

    TN = min(tile_items, N)
    n_pad = (-N) % TN
    if n_pad:
        x = jnp.concatenate([x, jnp.zeros((n_pad, L, D), x.dtype)], axis=0)
    Np = N + n_pad

    kernel = functools.partial(encoder_kernel, num_heads=num_heads, d_k=d_k)
    out = pl.pallas_call(
        kernel,
        out_shape=jax.ShapeDtypeStruct((Np, HD), jnp.float32),
        grid=(Np // TN,),
        in_specs=[
            pl.BlockSpec((TN, L, D), lambda i: (i, 0, 0)),   # TN items / step
            pl.BlockSpec((D, 3 * HD), lambda i: (0, 0)),     # resident weights
            pl.BlockSpec((HD + 2, Q), lambda i: (0, 0)),
        ],
        out_specs=pl.BlockSpec((TN, HD), lambda i: (i, 0)),  # sublane-dense store
        compiler_params=pltpu.CompilerParams(
            dimension_semantics=("parallel",)),
    )(x, wqkv, att)
    return out[:N]


def nrms_forward(params, cand_idx, his_idx, labels, compute_loss=True):
    """Mirrors NRMS.forward(data, compute_loss=True)."""
    emb = params["embedding"]
    b, np_, l = cand_idx.shape
    _, hn, _ = his_idx.shape

    text_p = pack_encoder_params(params["text"])
    user_p = pack_encoder_params(params["user"])

    # embedding lookup (glue, mirrors nn.Embedding)
    cand_emb = jnp.take(emb, cand_idx.reshape(b * np_, l), axis=0)   # [B*NP, L, D]
    his_emb = jnp.take(emb, his_idx.reshape(b * hn, l), axis=0)      # [B*HN, L, D]

    # single fused text-encoder call over candidates + history
    text_in = jnp.concatenate([cand_emb, his_emb], axis=0)           # [B*(NP+HN), L, D]
    text_vec = run_encoder(text_in, text_p, num_heads=NUM_HEADS, d_k=D_K)
    cand_vec = text_vec[: b * np_].reshape(b, np_, NEWS_DIM)
    his_vec = text_vec[b * np_:].reshape(b, hn, NEWS_DIM)

    user_vec = run_encoder(his_vec, user_p, num_heads=NUM_HEADS, d_k=D_K)  # [B, ND]

    # score: tiny bmm -> plain JAX (fuses with log_softmax); no kernel needed
    score = jnp.einsum("bcd,bd->bc", cand_vec, user_vec)             # [B, NP]
    if not compute_loss:
        return score
    logp = jax.nn.log_softmax(score, axis=-1)
    loss = -jnp.mean(logp[jnp.arange(b), labels])                    # CrossEntropyLoss
    return loss, score


# ---------------- pure-JAX reference (for correctness check) ------------------
def encoder_ref(x, params, num_heads, d_k):
    wq, wk, wv, a1w, a1b, a2w, a2b = params
    n, l, _ = x.shape
    q = (x @ wq).reshape(n, l, num_heads, d_k).transpose(0, 2, 1, 3)
    k = (x @ wk).reshape(n, l, num_heads, d_k).transpose(0, 2, 1, 3)
    v = (x @ wv).reshape(n, l, num_heads, d_k).transpose(0, 2, 1, 3)
    s = jnp.einsum("nhld,nhmd->nhlm", q, k) / math.sqrt(d_k)
    a = jax.nn.softmax(s, axis=-1)
    ctx = jnp.einsum("nhlm,nhmd->nhld", a, v).transpose(0, 2, 1, 3)
    ctx = ctx.reshape(n, l, num_heads * d_k)
    e = jnp.tanh(ctx @ a1w + a1b)
    alpha = jnp.exp(e @ a2w + a2b)
    alpha = alpha / (jnp.sum(alpha, axis=1, keepdims=True) + 1e-8)
    return jnp.sum(alpha * ctx, axis=1)


def nrms_ref(params, cand_idx, his_idx, labels):
    emb = params["embedding"]
    b, np_, l = cand_idx.shape
    _, hn, _ = his_idx.shape
    cand_emb = jnp.take(emb, cand_idx.reshape(b * np_, l), axis=0)
    his_emb = jnp.take(emb, his_idx.reshape(b * hn, l), axis=0)
    cand_vec = encoder_ref(cand_emb, params["text"], NUM_HEADS, D_K).reshape(b, np_, NEWS_DIM)
    his_vec = encoder_ref(his_emb, params["text"], NUM_HEADS, D_K).reshape(b, hn, NEWS_DIM)
    user_vec = encoder_ref(his_vec, params["user"], NUM_HEADS, D_K)
    score = jnp.einsum("bcd,bd->bc", cand_vec, user_vec)
    logp = jax.nn.log_softmax(score, axis=-1)
    loss = -jnp.mean(logp[jnp.arange(b), labels])
    return loss, score


# ---------------- deterministic parameter init --------------------------------
def init_encoder_params(key, in_dim, num_heads, d_k, q_dim):
    ks = jax.random.split(key, 7)
    hd = num_heads * d_k
    sc = 0.1
    return (
        jax.random.normal(ks[0], (in_dim, hd), jnp.float32) * sc,   # W_Q
        jax.random.normal(ks[1], (in_dim, hd), jnp.float32) * sc,   # W_K
        jax.random.normal(ks[2], (in_dim, hd), jnp.float32) * sc,   # W_V
        jax.random.normal(ks[3], (hd, q_dim), jnp.float32) * sc,    # att_fc1.weight
        jax.random.normal(ks[4], (1, q_dim), jnp.float32) * sc,     # att_fc1.bias
        jax.random.normal(ks[5], (q_dim, 1), jnp.float32) * sc,     # att_fc2.weight
        jax.random.normal(ks[6], (1, 1), jnp.float32) * sc,         # att_fc2.bias
    )


if __name__ == "__main__":
    key = jax.random.PRNGKey(0)
    k_emb, k_text, k_user, k_cand, k_his, k_lbl = jax.random.split(key, 6)

    params = {
        "embedding": jax.random.normal(k_emb, (VOCAB, EMB_DIM), jnp.float32) * 0.3,
        "text": init_encoder_params(k_text, EMB_DIM, NUM_HEADS, D_K, QUERY_DIM),
        "user": init_encoder_params(k_user, NEWS_DIM, NUM_HEADS, D_K, QUERY_DIM),
    }

    cand_idx = jax.random.randint(k_cand, (B, NPRATIO, WORD_NUM), 0, VOCAB, jnp.int32)
    his_idx = jax.random.randint(k_his, (B, HIS_NUM, WORD_NUM), 0, VOCAB, jnp.int32)
    labels = jax.random.randint(k_lbl, (B,), 0, NPRATIO, jnp.int32)

    loss, score = nrms_forward(params, cand_idx, his_idx, labels, compute_loss=True)
    jax.block_until_ready((loss, score))

    ref_loss, ref_score = nrms_ref(params, cand_idx, his_idx, labels)
    assert jnp.allclose(score, ref_score, rtol=1e-3, atol=1e-3), (score, ref_score)
    assert jnp.allclose(loss, ref_loss, rtol=1e-3, atol=1e-3), (loss, ref_loss)

    print("KERNEL_OK")
</pallas_src>

<mosaic_0001>
module attributes {stable_mosaic.version = 11 : i64} {
  func.func @encoder_kernel(%arg0: i32, %arg1: memref<8x8x32xf32, #tpu.memory_space<vmem>>, %arg2: memref<32x96xf32, #tpu.memory_space<vmem>>, %arg3: memref<34x16xf32, #tpu.memory_space<vmem>>, %arg4: memref<8x32xf32, #tpu.memory_space<vmem>>) attributes {dimension_semantics = [#tpu.dimension_semantics<parallel>], iteration_bounds = array<i64: 3>, scalar_prefetch = 0 : i64, scratch_operands = 0 : i64, tpu.core_type = #tpu.core_type<tc>, window_params = [{transform_indices = @transform_0, window_bounds = array<i64: 8, 8, 32>}, {pipeline_mode = #tpu.pipeline_mode<synchronous>, transform_indices = @transform_1, window_bounds = array<i64: 32, 96>}, {pipeline_mode = #tpu.pipeline_mode<synchronous>, transform_indices = @transform_2, window_bounds = array<i64: 34, 16>}, {transform_indices = @transform_3, window_bounds = array<i64: 8, 32>}]} {
    %c0 = arith.constant 0 : index
    %c0_0 = arith.constant 0 : index
    %c0_1 = arith.constant 0 : index
    %0 = vector.load %arg1[%c0, %c0_0, %c0_1] : memref<8x8x32xf32, #tpu.memory_space<vmem>>, vector<8x8x32xf32>
    %1 = vector.shape_cast %0 : vector<8x8x32xf32> to vector<64x32xf32>
    %c0_2 = arith.constant 0 : index
    %c0_3 = arith.constant 0 : index
    %2 = vector.load %arg2[%c0_2, %c0_3] : memref<32x96xf32, #tpu.memory_space<vmem>>, vector<32x96xf32>
    %cst = arith.constant dense<0.000000e+00> : vector<64x96xf32>
    %3 = tpu.matmul %1, %2, %cst {dimension_numbers = #tpu.dot_dimension_numbers<[1], [0], [0], [1], [0, 0, 1, 1], [], []>} : vector<64x32xf32>, vector<32x96xf32>, vector<64x96xf32> -> vector<64x96xf32>
    %4 = vector.extract_strided_slice %3 {offsets = [0, 0], sizes = [64, 8], strides = [1, 1]} : vector<64x96xf32> to vector<64x8xf32>
    %5 = vector.shape_cast %4 : vector<64x8xf32> to vector<8x8x8xf32>
    %6 = vector.extract_strided_slice %3 {offsets = [0, 32], sizes = [64, 8], strides = [1, 1]} : vector<64x96xf32> to vector<64x8xf32>
    %7 = vector.shape_cast %6 : vector<64x8xf32> to vector<8x8x8xf32>
    %8 = vector.extract_strided_slice %3 {offsets = [0, 64], sizes = [64, 8], strides = [1, 1]} : vector<64x96xf32> to vector<64x8xf32>
    %9 = vector.shape_cast %8 : vector<64x8xf32> to vector<8x8x8xf32>
    "tpu.trace_start"() <{level = 10 : i32, message = "bqd,bkd->bqk"}> : () -> ()
    %cst_4 = arith.constant dense<0.000000e+00> : vector<8x8x8xf32>
    %10 = tpu.matmul %5, %7, %cst_4 {dimension_numbers = #tpu.dot_dimension_numbers<[2], [2], [1], [1], [0, 0, 0, 1, 1, 1], [0], [0]>} : vector<8x8x8xf32>, vector<8x8x8xf32>, vector<8x8x8xf32> -> vector<8x8x8xf32>
    "tpu.trace_stop"() : () -> ()
    %cst_5 = arith.constant 0.353553385 : f32
    %11 = vector.broadcast %cst_5 : f32 to vector<8x8x8xf32>
    %12 = arith.mulf %10, %11 : vector<8x8x8xf32>
    %cst_6 = arith.constant dense<0xFF800000> : vector<8x8xf32>
    %13 = vector.multi_reduction <maximumf>, %12, %cst_6 [2] : vector<8x8x8xf32> to vector<8x8xf32>
    %14 = vector.shape_cast %13 : vector<8x8xf32> to vector<8x8x1xf32>
    %15 = vector.broadcast %14 : vector<8x8x1xf32> to vector<8x8x8xf32>
    %16 = arith.subf %12, %15 : vector<8x8x8xf32>
    %17 = math.exp %16 : vector<8x8x8xf32>
    %cst_7 = arith.constant dense<0.000000e+00> : vector<8x8xf32>
    %18 = vector.multi_reduction <add>, %17, %cst_7 [2] : vector<8x8x8xf32> to vector<8x8xf32>
    %19 = vector.shape_cast %18 : vector<8x8xf32> to vector<8x8x1xf32>
    %20 = tpu.reciprocal %19 {approx = true} : vector<8x8x1xf32> -> vector<8x8x1xf32>
    %21 = vector.broadcast %20 : vector<8x8x1xf32> to vector<8x8x8xf32>
    %22 = arith.mulf %17, %21 : vector<8x8x8xf32>
    "tpu.trace_start"() <{level = 10 : i32, message = "bqk,bkd->bqd"}> : () -> ()
    %cst_8 = arith.constant dense<0.000000e+00> : vector<8x8x8xf32>
    %23 = tpu.matmul %22, %9, %cst_8 {dimension_numbers = #tpu.dot_dimension_numbers<[2], [1], [1], [2], [0, 0, 0, 1, 1, 2], [0], [0]>} : vector<8x8x8xf32>, vector<8x8x8xf32>, vector<8x8x8xf32> -> vector<8x8x8xf32>
    "tpu.trace_stop"() : () -> ()
    %24 = vector.extract_strided_slice %3 {offsets = [0, 8], sizes = [64, 8], strides = [1, 1]} : vector<64x96xf32> to vector<64x8xf32>
    %25 = vector.shape_cast %24 : vector<64x8xf32> to vector<8x8x8xf32>
    %26 = vector.extract_strided_slice %3 {offsets = [0, 40], sizes = [64, 8], strides = [1, 1]} : vector<64x96xf32> to vector<64x8xf32>
    %27 = vector.shape_cast %26 : vector<64x8xf32> to vector<8x8x8xf32>
    %28 = vector.extract_strided_slice %3 {offsets = [0, 72], sizes = [64, 8], strides = [1, 1]} : vector<64x96xf32> to vector<64x8xf32>
    %29 = vector.shape_cast %28 : vector<64x8xf32> to vector<8x8x8xf32>
    "tpu.trace_start"() <{level = 10 : i32, message = "bqd,bkd->bqk"}> : () -> ()
    %cst_9 = arith.constant dense<0.000000e+00> : vector<8x8x8xf32>
    %30 = tpu.matmul %25, %27, %cst_9 {dimension_numbers = #tpu.dot_dimension_numbers<[2], [2], [1], [1], [0, 0, 0, 1, 1, 1], [0], [0]>} : vector<8x8x8xf32>, vector<8x8x8xf32>, vector<8x8x8xf32> -> vector<8x8x8xf32>
    "tpu.trace_stop"() : () -> ()
    %cst_10 = arith.constant 0.353553385 : f32
    %31 = vector.broadcast %cst_10 : f32 to vector<8x8x8xf32>
    %32 = arith.mulf %30, %31 : vector<8x8x8xf32>
    %cst_11 = arith.constant dense<0xFF800000> : vector<8x8xf32>
    %33 = vector.multi_reduction <maximumf>, %32, %cst_11 [2] : vector<8x8x8xf32> to vector<8x8xf32>
    %34 = vector.shape_cast %33 : vector<8x8xf32> to vector<8x8x1xf32>
    %35 = vector.broadcast %34 : vector<8x8x1xf32> to vector<8x8x8xf32>
    %36 = arith.subf %32, %35 : vector<8x8x8xf32>
    %37 = math.exp %36 : vector<8x8x8xf32>
    %cst_12 = arith.constant dense<0.000000e+00> : vector<8x8xf32>
    %38 = vector.multi_reduction <add>, %37, %cst_12 [2] : vector<8x8x8xf32> to vector<8x8xf32>
    %39 = vector.shape_cast %38 : vector<8x8xf32> to vector<8x8x1xf32>
    %40 = tpu.reciprocal %39 {approx = true} : vector<8x8x1xf32> -> vector<8x8x1xf32>
    %41 = vector.broadcast %40 : vector<8x8x1xf32> to vector<8x8x8xf32>
    %42 = arith.mulf %37, %41 : vector<8x8x8xf32>
    "tpu.trace_start"() <{level = 10 : i32, message = "bqk,bkd->bqd"}> : () -> ()
    %cst_13 = arith.constant dense<0.000000e+00> : vector<8x8x8xf32>
    %43 = tpu.matmul %42, %29, %cst_13 {dimension_numbers = #tpu.dot_dimension_numbers<[2], [1], [1], [2], [0, 0, 0, 1, 1, 2], [0], [0]>} : vector<8x8x8xf32>, vector<8x8x8xf32>, vector<8x8x8xf32> -> vector<8x8x8xf32>
    "tpu.trace_stop"() : () -> ()
    %44 = vector.extract_strided_slice %3 {offsets = [0, 16], sizes = [64, 8], strides = [1, 1]} : vector<64x96xf32> to vector<64x8xf32>
    %45 = vector.shape_cast %44 : vector<64x8xf32> to vector<8x8x8xf32>
    %46 = vector.extract_strided_slice %3 {offsets = [0, 48], sizes = [64, 8], strides = [1, 1]} : vector<64x96xf32> to vector<64x8xf32>
    %47 = vector.shape_cast %46 : vector<64x8xf32> to vector<8x8x8xf32>
    %48 = vector.extract_strided_slice %3 {offsets = [0, 80], sizes = [64, 8], strides = [1, 1]} : vector<64x96xf32> to vector<64x8xf32>
    %49 = vector.shape_cast %48 : vector<64x8xf32> to vector<8x8x8xf32>
    "tpu.trace_start"() <{level = 10 : i32, message = "bqd,bkd->bqk"}> : () -> ()
    %cst_14 = arith.constant dense<0.000000e+00> : vector<8x8x8xf32>
    %50 = tpu.matmul %45, %47, %cst_14 {dimension_numbers = #tpu.dot_dimension_numbers<[2], [2], [1], [1], [0, 0, 0, 1, 1, 1], [0], [0]>} : vector<8x8x8xf32>, vector<8x8x8xf32>, vector<8x8x8xf32> -> vector<8x8x8xf32>
    "tpu.trace_stop"() : () -> ()
    %cst_15 = arith.constant 0.353553385 : f32
    %51 = vector.broadcast %cst_15 : f32 to vector<8x8x8xf32>
    %52 = arith.mulf %50, %51 : vector<8x8x8xf32>
    %cst_16 = arith.constant dense<0xFF800000> : vector<8x8xf32>
    %53 = vector.multi_reduction <maximumf>, %52, %cst_16 [2] : vector<8x8x8xf32> to vector<8x8xf32>
    %54 = vector.shape_cast %53 : vector<8x8xf32> to vector<8x8x1xf32>
    %55 = vector.broadcast %54 : vector<8x8x1xf32> to vector<8x8x8xf32>
    %56 = arith.subf %52, %55 : vector<8x8x8xf32>
    %57 = math.exp %56 : vector<8x8x8xf32>
    %cst_17 = arith.constant dense<0.000000e+00> : vector<8x8xf32>
    %58 = vector.multi_reduction <add>, %57, %cst_17 [2] : vector<8x8x8xf32> to vector<8x8xf32>
    %59 = vector.shape_cast %58 : vector<8x8xf32> to vector<8x8x1xf32>
    %60 = tpu.reciprocal %59 {approx = true} : vector<8x8x1xf32> -> vector<8x8x1xf32>
    %61 = vector.broadcast %60 : vector<8x8x1xf32> to vector<8x8x8xf32>
    %62 = arith.mulf %57, %61 : vector<8x8x8xf32>
    "tpu.trace_start"() <{level = 10 : i32, message = "bqk,bkd->bqd"}> : () -> ()
    %cst_18 = arith.constant dense<0.000000e+00> : vector<8x8x8xf32>
    %63 = tpu.matmul %62, %49, %cst_18 {dimension_numbers = #tpu.dot_dimension_numbers<[2], [1], [1], [2], [0, 0, 0, 1, 1, 2], [0], [0]>} : vector<8x8x8xf32>, vector<8x8x8xf32>, vector<8x8x8xf32> -> vector<8x8x8xf32>
    "tpu.trace_stop"() : () -> ()
    %64 = vector.extract_strided_slice %3 {offsets = [0, 24], sizes = [64, 8], strides = [1, 1]} : vector<64x96xf32> to vector<64x8xf32>
    %65 = vector.shape_cast %64 : vector<64x8xf32> to vector<8x8x8xf32>
    %66 = vector.extract_strided_slice %3 {offsets = [0, 56], sizes = [64, 8], strides = [1, 1]} : vector<64x96xf32> to vector<64x8xf32>
    %67 = vector.shape_cast %66 : vector<64x8xf32> to vector<8x8x8xf32>
    %68 = vector.extract_strided_slice %3 {offsets = [0, 88], sizes = [64, 8], strides = [1, 1]} : vector<64x96xf32> to vector<64x8xf32>
    %69 = vector.shape_cast %68 : vector<64x8xf32> to vector<8x8x8xf32>
    "tpu.trace_start"() <{level = 10 : i32, message = "bqd,bkd->bqk"}> : () -> ()
    %cst_19 = arith.constant dense<0.000000e+00> : vector<8x8x8xf32>
    %70 = tpu.matmul %65, %67, %cst_19 {dimension_numbers = #tpu.dot_dimension_numbers<[2], [2], [1], [1], [0, 0, 0, 1, 1, 1], [0], [0]>} : vector<8x8x8xf32>, vector<8x8x8xf32>, vector<8x8x8xf32> -> vector<8x8x8xf32>
    "tpu.trace_stop"() : () -> ()
    %cst_20 = arith.constant 0.353553385 : f32
    %71 = vector.broadcast %cst_20 : f32 to vector<8x8x8xf32>
    %72 = arith.mulf %70, %71 : vector<8x8x8xf32>
    %cst_21 = arith.constant dense<0xFF800000> : vector<8x8xf32>
    %73 = vector.multi_reduction <maximumf>, %72, %cst_21 [2] : vector<8x8x8xf32> to vector<8x8xf32>
    %74 = vector.shape_cast %73 : vector<8x8xf32> to vector<8x8x1xf32>
    %75 = vector.broadcast %74 : vector<8x8x1xf32> to vector<8x8x8xf32>
    %76 = arith.subf %72, %75 : vector<8x8x8xf32>
    %77 = math.exp %76 : vector<8x8x8xf32>
    %cst_22 = arith.constant dense<0.000000e+00> : vector<8x8xf32>
    %78 = vector.multi_reduction <add>, %77, %cst_22 [2] : vector<8x8x8xf32> to vector<8x8xf32>
    %79 = vector.shape_cast %78 : vector<8x8xf32> to vector<8x8x1xf32>
    %80 = tpu.reciprocal %79 {approx = true} : vector<8x8x1xf32> -> vector<8x8x1xf32>
    %81 = vector.broadcast %80 : vector<8x8x1xf32> to vector<8x8x8xf32>
    %82 = arith.mulf %77, %81 : vector<8x8x8xf32>
    "tpu.trace_start"() <{level = 10 : i32, message = "bqk,bkd->bqd"}> : () -> ()
    %cst_23 = arith.constant dense<0.000000e+00> : vector<8x8x8xf32>
    %83 = tpu.matmul %82, %69, %cst_23 {dimension_numbers = #tpu.dot_dimension_numbers<[2], [1], [1], [2], [0, 0, 0, 1, 1, 2], [0], [0]>} : vector<8x8x8xf32>, vector<8x8x8xf32>, vector<8x8x8xf32> -> vector<8x8x8xf32>
    "tpu.trace_stop"() : () -> ()
    %84 = tpu.concatenate %23, %43, %63, %83 in 2 : vector<8x8x8xf32>, vector<8x8x8xf32>, vector<8x8x8xf32>, vector<8x8x8xf32> -> vector<8x8x32xf32>
    %85 = vector.shape_cast %84 : vector<8x8x32xf32> to vector<64x32xf32>
    %c0_24 = arith.constant 0 : index
    %c0_25 = arith.constant 0 : index
    %86 = vector.load %arg3[%c0_24, %c0_25] : memref<34x16xf32, #tpu.memory_space<vmem>>, vector<32x16xf32>
    %c32 = arith.constant 32 : index
    %c0_26 = arith.constant 0 : index
    %87 = vector.load %arg3[%c32, %c0_26] : memref<34x16xf32, #tpu.memory_space<vmem>>, vector<1x16xf32>
    %c33 = arith.constant 33 : index
    %c0_27 = arith.constant 0 : index
    %88 = vector.load %arg3[%c33, %c0_27] : memref<34x16xf32, #tpu.memory_space<vmem>>, vector<1x16xf32>
    %cst_28 = arith.constant dense<0.000000e+00> : vector<64x16xf32>
    %89 = tpu.matmul %85, %86, %cst_28 {dimension_numbers = #tpu.dot_dimension_numbers<[1], [0], [0], [1], [0, 0, 1, 1], [], []>} : vector<64x32xf32>, vector<32x16xf32>, vector<64x16xf32> -> vector<64x16xf32>
    %90 = vector.broadcast %87 : vector<1x16xf32> to vector<64x16xf32>
    %91 = arith.addf %89, %90 : vector<64x16xf32>
    %92 = math.tanh %91 : vector<64x16xf32>
    %93 = vector.broadcast %88 : vector<1x16xf32> to vector<64x16xf32>
    %94 = arith.mulf %92, %93 : vector<64x16xf32>
    %cst_29 = arith.constant dense<0.000000e+00> : vector<64xf32>
    %95 = vector.multi_reduction <add>, %94, %cst_29 [1] : vector<64x16xf32> to vector<64xf32>
    %96 = vector.shape_cast %95 : vector<64xf32> to vector<64x1xf32>
    %97 = vector.shape_cast %96 : vector<64x1xf32> to vector<8x8x1xf32>
    %cst_30 = arith.constant dense<0xFF800000> : vector<8x1xf32>
    %98 = vector.multi_reduction <maximumf>, %97, %cst_30 [1] : vector<8x8x1xf32> to vector<8x1xf32>
    %99 = vector.shape_cast %98 : vector<8x1xf32> to vector<8x1x1xf32>
    %100 = vector.broadcast %99 : vector<8x1x1xf32> to vector<8x8x1xf32>
    %101 = arith.subf %97, %100 : vector<8x8x1xf32>
    %102 = math.exp %101 : vector<8x8x1xf32>
    %cst_31 = arith.constant dense<0.000000e+00> : vector<8x1xf32>
    %103 = vector.multi_reduction <add>, %102, %cst_31 [1] : vector<8x8x1xf32> to vector<8x1xf32>
    %104 = vector.shape_cast %103 : vector<8x1xf32> to vector<8x1x1xf32>
    %cst_32 = arith.constant 9.99999993E-9 : f32
    %105 = vector.broadcast %cst_32 : f32 to vector<8x1x1xf32>
    %106 = arith.addf %104, %105 : vector<8x1x1xf32>
    %107 = tpu.reciprocal %106 {approx = true} : vector<8x1x1xf32> -> vector<8x1x1xf32>
    %108 = vector.broadcast %107 : vector<8x1x1xf32> to vector<8x8x1xf32>
    %109 = arith.mulf %102, %108 : vector<8x8x1xf32>
    %110 = vector.broadcast %109 : vector<8x8x1xf32> to vector<8x8x32xf32>
    %111 = arith.mulf %110, %84 : vector<8x8x32xf32>
    %cst_33 = arith.constant dense<0.000000e+00> : vector<8x32xf32>
    %112 = vector.multi_reduction <add>, %111, %cst_33 [1] : vector<8x8x32xf32> to vector<8x32xf32>
    %c0_34 = arith.constant 0 : index
    %c0_35 = arith.constant 0 : index
    %113 = vector.load %arg4[%c0_34, %c0_35] : memref<8x32xf32, #tpu.memory_space<vmem>>, vector<8x32xf32>
    tpu.vector_store %arg4[%c0_34, %c0_35], %112 {strides = array<i32>} : memref<8x32xf32, #tpu.memory_space<vmem>>, vector<8x32xf32>,
    return
  }
  func.func @transform_0(%arg0: i32) -> (i32, i32, i32) {
    %c0_i32 = arith.constant 0 : i32
    %c0_i32_0 = arith.constant 0 : i32
    %c0_i32_1 = arith.constant 0 : i32
    return %arg0, %c0_i32, %c0_i32_0 : i32, i32, i32
  }
  func.func @transform_1(%arg0: i32) -> (i32, i32) {
    %c0_i32 = arith.constant 0 : i32
    %c0_i32_0 = arith.constant 0 : i32
    %c0_i32_1 = arith.constant 0 : i32
    return %c0_i32, %c0_i32_0 : i32, i32
  }
  func.func @transform_2(%arg0: i32) -> (i32, i32) {
    %c0_i32 = arith.constant 0 : i32
    %c0_i32_0 = arith.constant 0 : i32
    %c0_i32_1 = arith.constant 0 : i32
    return %c0_i32, %c0_i32_0 : i32, i32
  }
  func.func @transform_3(%arg0: i32) -> (i32, i32) {
    %c0_i32 = arith.constant 0 : i32
    %c0_i32_0 = arith.constant 0 : i32
    return %arg0, %c0_i32 : i32, i32
  }
}

</mosaic_0001>

<bundles_post_ra>
// kernel: tpu_custom_call.1
= control target key start
LH: loop header
LB: loop body
LE: loop exit
PB: predicated region body
PF: predicated region fallthrough
CT: control target
= control target key end

     0   :  { %8 = vsyncpa [#allocation3], 0  ;;  %s8427_s0 = inlined_call_operand.hbm [shape: f32[24,8,32], index: 0, kind: input, shape index: {}]   ;;  %s8428_s1 = inlined_call_operand.vmem [shape: f32[32,96], index: 1, kind: input, shape index: {}]   ;;  %s8429_s2 = inlined_call_operand.vmem [shape: f32[34,16], index: 2, kind: input, shape index: {}]   ;;  %s8430_s3 = inlined_call_operand.hbm [shape: f32[24,32], index: 3, kind: output, shape index: {}]  }
   0x1   :  { %10 = vsyncpa [#allocation3 + $0x1], 0 }
   0x2   :  { %11 = vsyncpa [#allocation4], 0 }
   0x3   :  { %13 = vsyncpa [#allocation4 + $0x1], 0  ;;  %s7292_s12 = smov 0   ;;  %s7294_s13 = smov 0  }
   0x4   :  { %s7296_s14 = smov 0   ;;  %s7298_s15 = smov 0  }
   0x5 LB: > { %s7313_s16 = sadd.s32 4294967295, %s7250_s15   ;;  %s6258_s17 = sadd.s32 4294967294, %s7250_s15   ;;  %s7250_s15 = sphi %s7298_s15, %s8442_s15   ;;  %s7246_s14 = sphi %s7296_s14, %s8441_s14   ;;  %s7242_s13 = sphi %s7294_s13, %s8440_s13   ;;  %s7238_s12 = sphi %s7292_s12, %s8439_s12  }
   0x6   : > { %s7317_s18 = sadd.s32 1, %s7250_s15   ;;  %s26_s19 = sadd.s32 1, %s7246_s14 }
   0x7   : > { %s23_s20 = ssub.s32 %s7250_s15, %s7317_s18  ;;  %p33_p0 = scmp.ne.s32.totalorder %s7246_s14, %s7242_s13 }
   0x8   : > { %p24_p1 = scmp.eq.s32.totalorder %s23_s20, 0  ;;  %p34_p2 = scmp.eq.s32.totalorder %s7250_s15, 0 }
   0x9   : > { %p39_p3 = scmp.ne.s32.totalorder %s7242_s13, %s7238_s12  ;;  %p40_p4 = scmp.eq.s32.totalorder %s7313_s16, 0 }
   0xa   : > { %s7329_s21 = scalar_select %p24_p1, %s7246_s14, %s26_s19  }
   0xb   : > { %p7331_p5 = por %p34_p2, %p33_p0  ;;  %p7335_p6 = por %p40_p4, %p39_p3 }
   0xc   : > { %p105_p7 = scmp.eq.s32.totalorder %s7313_s16, 2  ;;  %p111_p8 = scmp.eq.s32.totalorder %s6258_s17, 2 }
   0xd   : > { %p6926_p9 = scmp.lt.s32.totalorder %s7250_s15, 3  ;;  %s137_s26 = sand.u32 1, %s7246_s14  }
   0xe   : > { %p7341_p10 = por %p105_p7, %p33_p0  ;;  %p7345_p11 = por %p111_p8, %p39_p3 }
   0xf   : > { %s6385_s27 = sshll.u32 %s7250_s15, 10  ;;  %s6261_s28 = sshll.u32 %s137_s26, 6 }
  0x10   : > { %s8434_s24 = scalar_select %p7341_p10, 1, 0 }
  0x11   : > { %s8435_s25 = scalar_select %p7345_p11, 1, 0 }
  0x12   : > { %s7354_s4 = scalar_lea.hbm %s8427_s0, %s6385_s27  ;;  %s141_s5 = scalar_lea.vmem [#allocation2], %s6261_s28 }
  0x13   : > { %s148_s6 = sshll.u32 %s141_s5, 4  ;;  %p7358_p12 = pnand %p6926_p9, %p7331_p5  ;;  %s7362_s6 = int_to_ptr.vmem [resolvable:$true] %s148_s6 }
  0x14   : > { %s7364_s8 = scalar_lea.sflag [#allocation3], %s137_s26  ;;  %s7154_s9 = scalar_lea.hbm %s7354_s4, 1024 }
  0x15   : > { %p7155_p13 = scmp.ne.s32.totalorder %s7354_s4, %s7154_s9  ;;  %p7156_p0 = pneg %p7358_p12 }
  0x16   : > { %s7159_s17 = scalar_lea.hbm %s8427_s0, 3072  ;;  %p7160_p3 = scmp.lt.u32.totalorder %s7354_s4, %s8427_s0 }
  0x17   : > { %p7157_p1 = pnand %p7156_p0, %p7155_p13  ;;  %p7161_p4 = scmp.lt.u32.totalorder %s7159_s17, %s7154_s9 }
  0x18   : > { %p7163_p7 = scmp.lt.u32.totalorder %s7154_s9, %s7354_s4 }
  0x19   : > { %p7158_p2 = pneg %p7157_p1  ;;  %p7162_p5 = por %p7161_p4, %p7160_p3 }
  0x1b   : > { %p7164_p8 = por %p7163_p7, %p7162_p5 }
  0x1d   : > { %p7165_p9 = pnand %p7164_p8, %p7158_p2 }
  0x1f   : > { %7168 = shalt.err (!%p7165_p9)
}
  0x20   : > { %s7169_s22 = scalar_lea.vmem %s7362_s6, 1024  ;;  %s7252_s26 = smov [#allocation2]  }
  0x21   : > { %p7170_p13 = scmp.ne.s32.totalorder %s7362_s6, %s7169_s22  ;;  %s7174_s27 = sshll.u32 %s7252_s26, 4  ;;  %s7175_s27 = int_to_ptr.vmem [resolvable:$false] %s7174_s27 }
  0x22   : > { %s7176_s28 = scalar_lea.vmem %s7175_s27, 2048  ;;  %p7177_p10 = scmp.lt.s32.totalorder %s7362_s6, %s7175_s27 }
  0x23   : > { %p7172_p1 = pnand %p7170_p13, %p7156_p0  ;;  %p7178_p3 = scmp.lt.s32.totalorder %s7176_s28, %s7169_s22 }
  0x25   : > { %p7173_p11 = pneg %p7172_p1  ;;  %p7179_p4 = por %p7178_p3, %p7177_p10 }
  0x27   : > { %p7180_p5 = pnand %p7179_p4, %p7173_p11 }
  0x29   : > { %7183 = shalt.err (!%p7180_p5)
}
  0x2a   : > { %s7253_s29 = smov 128   ;;  %s7254_s30 = smov 8  }
  0x2b   : > { %6921 = dma.hbm_to_vmem [thread:$0]  (!%p7358_p12), %s7354_s4, 1024, %s7362_s6, %s7364_s8, %s7253_s29, %s7253_s29, %s7254_s30  }
  0x2c   : > { %p6264_p0 = scmp.ge.s32.totalorder %s7250_s15, 1  ;;  %p156_p2 = scmp.lt.s32.totalorder %s7250_s15, 4 }
  0x2e   : > { %p157_p7 = pnand %p6264_p0, %p156_p2 }
  0x2f   : > { %s7395_s5 = sand.u32 (!%p157_p7), 1, %s7242_s13  }
  0x30   : > { %160 = sbr.rel (%p157_p7) target bundleno = 3579 (0xdfb), region = 32  ;;  %s6265_s9 = sshll.u32 (!%p157_p7), %s7395_s5, 6 }
  0x31   : > { %s163_s10 = scalar_lea.sflag (!%p157_p7), [#allocation3], %s7395_s5  ;;  %s166_s11 = scalar_lea.vmem (!%p157_p7), [#allocation2], %s6265_s9 }
  0x37   : > { %7229 = dma.done.wait (%p7335_p6), %s163_s10, 1024  }
  0x38   : > { %7231 = vsyncadd (%p7335_p6), %s163_s10, 4294966272  ;;  %vm202_vm0 = vcmask 261120   ;;  %v198_v0 = vld [vmem:[%s8428_s1] sm:$0xff]  ;;  %v199_v1 = vld [vmem:[%s8428_s1 + $0x8] sm:$0xff]  ;;  %v7255_v14 = vmov 0.0   ;;  %vm7256_vm1 = vmmov 0  }
  0x39   : > { %v200_v2 = vld [vmem:[%s8428_s1 + $0x10] sm:$0xff]  ;;  %v6898_v3 = vpack.c.bf16 %v199_v1, %v198_v0  ;;  %v201_v4 = vld [vmem:[%s8428_s1 + $0x18] sm:$0xff]  ;;  %v190_v5 = vld [vmem:[%s166_s11] sm:$0xff]  ;;  %6568 = vmatprep.subr.mxu1 %v7255_v14  ;;  %6570 = vmatprep.mubr.msk.f32.mxu1 %vm7256_vm1, %v7255_v14  ;;  %s7257_s23 = smov 96   ;;  %vm335_vm2 = vcmask 64512   ;;  %s7258_s26 = smov 64  }
  0x3a   : > { %v6902_v6 = vpack.c.bf16 %v201_v4, %v200_v2  ;;  %6546 = vmatprep.mubr.msk.f32.mxu0 %vm202_vm0, %v190_v5  ;;  %v191_v7 = vld [vmem:[%s166_s11 + $0x8] sm:$0xff]  ;;  %v192_v8 = vld [vmem:[%s166_s11 + $0x10] sm:$0xff]  ;;  %v193_v9 = vld [vmem:[%s166_s11 + $0x18] sm:$0xff]  ;;  %s7259_s27 = smov 88   ;;  %s7260_s28 = smov 120   ;;  %vm5750_vm3 = vcmask 195584  }
  0x3b   : > { %6899 = vmatprep.subr.bf16.mxu0 %v6898_v3  ;;  %v194_v10 = vld [vmem:[%s166_s11 + $0x20] sm:$0xff]  ;;  %v195_v11 = vld [vmem:[%s166_s11 + $0x28] sm:$0xff]  ;;  %v196_v12 = vld [vmem:[%s166_s11 + $0x30] sm:$0xff]  ;;  %s7261_s29 = smov 56   ;;  %s7262_s30 = smov 80   ;;  %vm5741_vm4 = vcmask 130048  }
  0x3c   : > { %6901 = vmatpush3.bf16.msra.mxu0 %v6898_v3  ;;  %v197_v13 = vld [vmem:[%s166_s11 + $0x38] sm:$0xff]  ;;  %s7263_s9 = smov 112   ;;  %s7264_s10 = smov 48   ;;  %vm6158_vm5 = vcmask 1041409   ;;  %vm6160_vm6 = vcmask 1042434   ;;  %vm6162_vm7 = vcmask 1043459  }
  0x3d   : > { %6903 = vmatprep.subr.bf16.mxu0 %v6902_v6  ;;  %s7265_s11 = smov 72   ;;  %s7266_s4 = smov 104   ;;  %vm6164_vm8 = vcmask 1044484   ;;  %vm6166_vm9 = vcmask 1045509   ;;  %vm6168_vm10 = vcmask 1046534   ;;  %vm6170_vm11 = vcmask 1047559  }
  0x3e   : > { %s7267_s6 = smov 40   ;;  %s7268_s7 = smov 8  }
  0x3f   : > { %s7269_s8 = smov 16   ;;  %s6175_s22 = scalar_lea.sflag [#allocation4], %s7395_s5 }
  0x40   : > { %6905 = vmatpush3.bf16.msra.mxu0 %v6902_v6  ;;  %p8437_p10 = scmp.ne.s32.totalorder %s8434_s24, 0 }
  0x41   : > { %6558 = vmatprep.subr.mxu0 %v7255_v14 }
  0x43   : > { %6547 = vmatmul.mubr.msk.f32.vlgmr.msra.gmra.mrb[0].mxu0 %vm202_vm0, %v191_v7 }
  0x44   : > { %6549 = vmatprep.mubr.msk.f32.mxu0 %vm202_vm0, %v192_v8 }
  0x47   : > { %6550 = vmatmul.mubr.msk.f32.gmra.mrb[2].mxu0 %vm202_vm0, %v193_v9 }
  0x48   : > { %6552 = vmatprep.mubr.msk.f32.mxu0 %vm202_vm0, %v194_v10 }
  0x4b   : > { %6553 = vmatmul.mubr.msk.f32.gmra.mrb[4].mxu0 %vm202_vm0, %v195_v11 }
  0x4c   : > { %6555 = vmatprep.mubr.msk.f32.mxu0 %vm202_vm0, %v196_v12 }
  0x4f   : > { %6556 = vmatmul.mubr.msk.f32.gmra.mrb[6].mxu0 %vm202_vm0, %v197_v13 }
  0x50   : > { %6560 = vmatprep.mubr.msk.f32.mxu0 %vm7256_vm1, %v7255_v14 }
 0x116   : > { %v7429_v15 = vpop.f32.mrb[0].mxu0 }
 0x117   : > { %411 = vrot.lane.b32.xlu1 %v7429_v15, %s7257_s23  ;;  %v7432_v16 = vpop.f32.mrb[1].mxu0 }
 0x118   : > { %333 = vrot.lane.b32.xlu0 %v7432_v16, %s7257_s23 }
 0x11a   : > { %v7435_v17 = vpop.f32.mrb[2].mxu0 }
 0x11b   : > { %v7437_v18 = vpop.f32.mrb[3].mxu0  ;;  %565 = vrot.lane.b32.xlu1 %v7435_v17, %s7257_s23 }
 0x11c   : > { %488 = vrot.lane.b32.xlu0 %v7437_v18, %s7257_s23 }
 0x11e   : > { %v7441_v19 = vpop.f32.mrb[4].mxu0 }
 0x11f   : > { %719 = vrot.lane.b32.xlu1 %v7441_v19, %s7257_s23  ;;  %v7444_v20 = vpop.f32.mrb[5].mxu0 }
 0x120   : > { %642 = vrot.lane.b32.xlu0 %v7444_v20, %s7257_s23 }
 0x122   : > { %v7447_v21 = vpop.f32.mrb[6].mxu0 }
 0x123   : > { %873 = vrot.lane.b32.xlu1 %v7447_v21, %s7257_s23  ;;  %v7450_v22 = vpop.f32.mrb[7].mxu0 }
 0x124   : > { %796 = vrot.lane.b32.xlu0 %v7450_v22, %s7257_s23  ;;  %s7271_s23 = smov [#allocation5]  }
 0x189   : > { %v412_v23 = vpop.permute.xlu1 %411 }
 0x18a   : > { %v334_v24 = vpop.permute.xlu0 %333 }
 0x18b   : > { %6559 = vmatpush3.xpose.msk.msra.mxu0 %vm335_vm2, %v334_v24 }
 0x18c   : > { %6563 = vmatprep.subr.mxu0 %v7255_v14 }
 0x18d   : > { %v566_v25 = vpop.permute.xlu1 %565 }
 0x18e   : > { %6561 = vmatmul.mubr.msk.f32.vlgmr.msra.gmra.mrb[8].mxu0 %vm335_vm2, %v7432_v16  ;;  %v489_v26 = vpop.permute.xlu0 %488 }
 0x18f   : > { %6564 = vmatpush3.xpose.msk.msra.mxu0 %vm335_vm2, %v412_v23  ;;  %6569 = vmatpush3.xpose.msk.msra.mxu1 %vm335_vm2, %v489_v26 }
 0x190   : > { %6565 = vmatprep.mubr.msk.f32.mxu0 %vm7256_vm1, %v7255_v14  ;;  %6573 = vmatprep.subr.mxu1 %v7255_v14 }
 0x191   : > { %6583 = vmatprep.subr.mxu0 %v7255_v14  ;;  %v720_v27 = vpop.permute.xlu1 %719 }
 0x192   : > { %6566 = vmatmul.mubr.msk.f32.vlgmr.msra.gmra.mrb[10].mxu0 %vm335_vm2, %v7429_v15  ;;  %6571 = vmatmul.mubr.msk.f32.vlgmr.msra.gmra.mrb[0].mxu1 %vm335_vm2, %v7437_v18  ;;  %v643_v28 = vpop.permute.xlu0 %642 }
 0x193   : > { %6574 = vmatpush3.xpose.msk.msra.mxu1 %vm335_vm2, %v566_v25  ;;  %6584 = vmatpush3.xpose.msk.msra.mxu0 %vm335_vm2, %v720_v27 }
 0x194   : > { %6575 = vmatprep.mubr.msk.f32.mxu1 %vm7256_vm1, %v7255_v14  ;;  %6585 = vmatprep.mubr.msk.f32.mxu0 %vm7256_vm1, %v7255_v14 }
 0x195   : > { %6578 = vmatprep.subr.mxu1 %v7255_v14  ;;  %6593 = vmatprep.subr.mxu0 %v7255_v14  ;;  %v874_v29 = vpop.permute.xlu1 %873 }
 0x196   : > { %6576 = vmatmul.mubr.msk.f32.vlgmr.msra.gmra.mrb[2].mxu1 %vm335_vm2, %v7435_v17  ;;  %6586 = vmatmul.mubr.msk.f32.vlgmr.msra.gmra.mrb[12].mxu0 %vm335_vm2, %v7441_v19  ;;  %v797_v30 = vpop.permute.xlu0 %796 }
 0x197   : > { %6579 = vmatpush3.xpose.msk.msra.mxu1 %vm335_vm2, %v643_v28  ;;  %6580 = vmatprep.mubr.msk.f32.mxu1 %vm7256_vm1, %v7255_v14 }
 0x198   : > { %6594 = vmatpush3.xpose.msk.msra.mxu0 %vm335_vm2, %v874_v29  ;;  %6595 = vmatprep.mubr.msk.f32.mxu0 %vm7256_vm1, %v7255_v14 }
 0x199   : > { %6588 = vmatprep.subr.mxu1 %v7255_v14  ;;  %6603 = vmatprep.subr.mxu0 %v7255_v14 }
 0x19a   : > { %6581 = vmatmul.mubr.msk.f32.vlgmr.msra.gmra.mrb[4].mxu1 %vm335_vm2, %v7444_v20 }
 0x19b   : > { %6596 = vmatmul.mubr.msk.f32.vlgmr.msra.gmra.mrb[14].mxu0 %vm335_vm2, %v7447_v21  ;;  %6589 = vmatpush3.xpose.msk.msra.mxu1 %vm335_vm2, %v797_v30 }
 0x19c   : > { %6590 = vmatprep.mubr.msk.f32.mxu1 %vm7256_vm1, %v7255_v14  ;;  %6598 = vmatprep.subr.mxu1 %v7255_v14 }
 0x19d   : > { %6605 = vmatprep.mubr.msk.f32.mxu0 %vm7256_vm1, %v7255_v14 }
 0x19e   : > { %6591 = vmatmul.mubr.msk.f32.vlgmr.msra.gmra.mrb[6].mxu1 %vm335_vm2, %v7450_v22 }
 0x19f   : > { %6600 = vmatprep.mubr.msk.f32.mxu1 %vm7256_vm1, %v7255_v14 }
 0x261   : > { %v406_v31 = vpop.f32.mrb[8].mxu0 }
 0x262   : > { %v7501_v32 = vmul.f32 0.35355338, %v406_v31  ;;  %v6562_v33 = vpop.f32.mrb[9].mxu0 }
 0x264   : > { %v957_v34 = vsel %vm335_vm2, %v7501_v32, -inf }
 0x265   : > { %v560_v35 = vpop.f32.mrb[0].mxu1  ;;  %958 = vmax.xlane.f32.xlu0 %v957_v34  ;;  %v483_v36 = vpop.f32.mrb[10].mxu0 }
 0x266   : > { %v7505_v37 = vmul.f32 0.35355338, %v560_v35  ;;  %v950_v38 = vmul.f32 0.35355338, %v483_v36  ;;  %v6567_v39 = vpop.f32.mrb[11].mxu0  ;;  %v6572_v40 = vpop.f32.mrb[1].mxu1 }
 0x268   : > { %v963_v41 = vsel %vm335_vm2, %v7505_v37, -inf  ;;  %v960_v42 = vsel %vm335_vm2, %v950_v38, -inf }
 0x269   : > { %v637_v43 = vpop.f32.mrb[2].mxu1  ;;  %964 = vmax.xlane.f32.xlu0 %v963_v41  ;;  %961 = vmax.xlane.f32.xlu1 %v960_v42  ;;  %v791_v44 = vpop.f32.mrb[12].mxu0 }
 0x26a   : > { %v952_v45 = vmul.f32 0.35355338, %v637_v43  ;;  %v6577_v46 = vpop.f32.mrb[3].mxu1  ;;  %v6587_v47 = vpop.f32.mrb[13].mxu0  ;;  %v954_v48 = vmul.f32 0.35355338, %v791_v44 }
 0x26c   : > { %v966_v49 = vsel %vm335_vm2, %v952_v45, -inf  ;;  %v972_v54 = vsel %vm335_vm2, %v954_v48, -inf }
 0x26d   : > { %v714_v50 = vpop.f32.mrb[4].mxu1  ;;  %967 = vmax.xlane.f32.xlu0 %v966_v49 }
 0x26e   : > { %v6582_v51 = vpop.f32.mrb[5].mxu1  ;;  %v945_v52 = vpop.f32.mrb[14].mxu0  ;;  %v7519_v59 = vmul.f32 0.35355338, %v714_v50 }
 0x26f   : > { %v6597_v53 = vpop.f32.mrb[15].mxu0  ;;  %v956_v55 = vmul.f32 0.35355338, %v945_v52 }
 0x270   : > { %v969_v60 = vsel %vm335_vm2, %v7519_v59, -inf }
 0x271   : > { %973 = vmax.xlane.f32.xlu0 %v972_v54  ;;  %v868_v56 = vpop.f32.mrb[6].mxu1  ;;  %v978_v58 = vsel %vm335_vm2, %v956_v55, -inf }
 0x272   : > { %v6592_v57 = vpop.f32.mrb[7].mxu1  ;;  %v7535_v61 = vmul.f32 0.35355338, %v868_v56 }
 0x274   : > { %v975_v62 = vsel %vm335_vm2, %v7535_v61, -inf }
 0x275   : > { %979 = vmax.xlane.f32.xlu0 %v978_v58 }
 0x27a   : > { %1045 = vrot.lane.b32.xlu1 %v7432_v16, %s7258_s26 }
 0x28b   : > { %1121 = vrot.lane.b32.xlu0 %v7429_v15, %s7258_s26 }
 0x28f   : > { %1349 = vrot.lane.b32.xlu0 %v7444_v20, %s7258_s26 }
 0x293   : > { %1501 = vrot.lane.b32.xlu0 %v7450_v22, %s7258_s26 }
 0x297   : > { %1655 = vrot.lane.b32.xlu0 %v7432_v16, %s7259_s27 }
 0x29b   : > { %1653 = vrot.lane.b32.xlu0 %v7432_v16, %s7260_s28 }
 0x29e   : > { %970 = vmax.xlane.f32.xlu1 %v969_v60 }
 0x29f   : > { %1811 = vrot.lane.b32.xlu0 %v7437_v18, %s7259_s27 }
 0x2af   : > { %1197 = vrot.lane.b32.xlu1 %v7437_v18, %s7258_s26 }
 0x2b3   : > { %1273 = vrot.lane.b32.xlu1 %v7435_v17, %s7258_s26 }
 0x2b7   : > { %1425 = vrot.lane.b32.xlu1 %v7441_v19, %s7258_s26 }
 0x2bb   : > { %1577 = vrot.lane.b32.xlu1 %v7447_v21, %s7258_s26  ;;  %s7188_s26 = sshll.u32 %s7271_s23, 4  ;;  %s7189_s26 = int_to_ptr.vmem [resolvable:$false] %s7188_s26 }
 0x2bf   : > { %1733 = vrot.lane.b32.xlu1 %v7429_v15, %s7259_s27 }
 0x2c3   : > { %1731 = vrot.lane.b32.xlu1 %v7429_v15, %s7260_s28 }
 0x2e7   : > { %976 = vmax.xlane.f32.xlu1 %v975_v62 }
 0x2f2   : > { %v959_v63 = vpop.xlane.xlu0 %958 }
 0x2f3   : > { %v981_v24 = vsub.f32 %v7501_v32, %v959_v63 }
 0x2f5   : > { %v989_v28 = vmul.f32 1.442695, %v981_v24 }
 0x2f6   : > { %v965_v0 = vpop.xlane.xlu0 %964  ;;  %v962_v1 = vpop.xlane.xlu1 %961 }
 0x2f7   : > { %v982_v2 = vsub.f32 %v950_v38, %v962_v1  ;;  %v983_v29 = vsub.f32 %v7505_v37, %v965_v0 }
 0x2f8   : > { %1889 = vrot.lane.b32.xlu1 %v7435_v17, %s7259_s27 }
 0x2f9   : > { %v991_v3 = vmul.f32 1.442695, %v982_v2  ;;  %v993_v32 = vmul.f32 1.442695, %v983_v29 }
 0x2fa   : > { %v968_v4 = vpop.xlane.xlu0 %967  ;;  %v1046_v5 = vpop.permute.xlu1 %1045 }
 0x2fb   : > { %v984_v6 = vsub.f32 %v952_v45, %v968_v4  ;;  %6599 = vmatpush3.msra.mxu1 %v1046_v5  ;;  %6978 = vpow2.f32 %v991_v3 }
 0x2fc   : > { %6608 = vmatprep.subr.mxu1 %v7255_v14 }
 0x2fd   : > { %v995_v7 = vmul.f32 1.442695, %v984_v6 }
 0x2fe   : > { %v974_v8 = vpop.xlane.xlu0 %973 }
 0x2ff   : > { %6980 = vpow2.f32 %v995_v7  ;;  %v986_v9 = vsub.f32 %v954_v48, %v974_v8 }
 0x301   : > { %v999_v10 = vmul.f32 1.442695, %v986_v9 }
 0x302   : > { %v980_v11 = vpop.xlane.xlu0 %979 }
 0x303   : > { %6982 = vpow2.f32 %v999_v10  ;;  %v988_v12 = vsub.f32 %v956_v55, %v980_v11 }
 0x305   : > { %v1003_v13 = vmul.f32 1.442695, %v988_v12  ;;  %v7542_v23 = vpop.eup %6978 }
 0x306   : > { %v1122_v25 = vpop.permute.xlu0 %1121  ;;  %v1008_v26 = vsel %vm335_vm2, %v7542_v23, 0.0 }
 0x307   : > { %6984 = vpow2.f32 %v1003_v13  ;;  %6604 = vmatpush3.msra.mxu0 %v1122_v25  ;;  %1009 = vadd.xlane.f32.xlu0 %v1008_v26 }
 0x308   : > { %6613 = vmatprep.subr.mxu0 %v7255_v14  ;;  %6986 = vpow2.f32 %v989_v28 }
 0x309   : > { %v7548_v27 = vpop.eup %6980  ;;  %6988 = vpow2.f32 %v993_v32 }
 0x30a   : > { %v1014_v30 = vsel %vm335_vm2, %v7548_v27, 0.0  ;;  %v7589_v54 = vpop.permute.xlu0 %1349 }
 0x30b   : > { %1015 = vadd.xlane.f32.xlu0 %v1014_v30 }
 0x30d   : > { %v7553_v31 = vpop.eup %6982 }
 0x30e   : > { %v1020_v33 = vsel %vm335_vm2, %v7553_v31, 0.0  ;;  %v7591_v55 = vpop.permute.xlu0 %1501 }
 0x30f   : > { %1021 = vadd.xlane.f32.xlu0 %v1020_v33 }
 0x311   : > { %v7557_v34 = vpop.eup %6984 }
 0x312   : > { %v1026_v35 = vsel %vm335_vm2, %v7557_v34, 0.0  ;;  %v7561_v36 = vpop.eup %6986  ;;  %v7597_v58 = vpop.permute.xlu0 %1655 }
 0x313   : > { %1027 = vadd.xlane.f32.xlu0 %v1026_v35  ;;  %v1005_v37 = vsel %vm335_vm2, %v7561_v36, 0.0  ;;  %v7565_v38 = vpop.eup %6988 }
 0x314   : > { %v1011_v39 = vsel %vm335_vm2, %v7565_v38, 0.0 }
 0x31c   : > { %1006 = vadd.xlane.f32.xlu1 %v1005_v37 }
 0x320   : > { %1012 = vadd.xlane.f32.xlu1 %v1011_v39 }
 0x329   : > { %1809 = vrot.lane.b32.xlu0 %v7437_v18, %s7260_s28 }
 0x32b   : > { %v971_v40 = vpop.xlane.xlu1 %970 }
 0x32c   : > { %v985_v41 = vsub.f32 %v7519_v59, %v971_v40  ;;  %v7599_v59 = vpop.permute.xlu0 %1653 }
 0x32d   : > { %1967 = vrot.lane.b32.xlu0 %v7444_v20, %s7259_s27 }
 0x32e   : > { %v997_v42 = vmul.f32 1.442695, %v985_v41 }
 0x32f   : > { %v7586_v45 = vpop.permute.xlu1 %1197 }
 0x330   : > { %6990 = vpow2.f32 %v997_v42  ;;  %v7601_v60 = vpop.permute.xlu0 %1811 }
 0x331   : > { %1965 = vrot.lane.b32.xlu0 %v7444_v20, %s7260_s28 }
 0x333   : > { %v1274_v46 = vpop.permute.xlu1 %1273 }
 0x335   : > { %2123 = vrot.lane.b32.xlu0 %v7450_v22, %s7259_s27 }
 0x337   : > { %v1426_v47 = vpop.permute.xlu1 %1425 }
 0x339   : > { %2121 = vrot.lane.b32.xlu0 %v7450_v22, %s7260_s28 }
 0x33a   : > { %v7578_v43 = vpop.eup %6990 }
 0x33b   : > { %v1017_v44 = vsel %vm335_vm2, %v7578_v43, 0.0  ;;  %v1578_v48 = vpop.permute.xlu1 %1577 }
 0x33c   : > { %1018 = vadd.xlane.f32.xlu1 %v1017_v44 }
 0x33f   : > { %v1734_v49 = vpop.permute.xlu1 %1733 }
 0x343   : > { %v1732_v50 = vpop.permute.xlu1 %1731 }
 0x34d   : > { %1887 = vrot.lane.b32.xlu1 %v7435_v17, %s7260_s28 }
 0x374   : > { %v977_v51 = vpop.xlane.xlu1 %976 }
 0x375   : > { %v987_v52 = vsub.f32 %v7535_v61, %v977_v51 }
 0x377   : > { %v1001_v53 = vmul.f32 1.442695, %v987_v52 }
 0x378   : > { %v1890_v4 = vpop.permute.xlu1 %1889 }
 0x379   : > { %6992 = vpow2.f32 %v1001_v53 }
 0x383   : > { %v7593_v56 = vpop.eup %6992 }
 0x384   : > { %v1023_v57 = vsel %vm335_vm2, %v7593_v56, 0.0 }
 0x385   : > { %1024 = vadd.xlane.f32.xlu1 %v1023_v57 }
 0x394   : > { %v1010_v62 = vpop.xlane.xlu0 %1009 }
 0x395   : > { %6994 = vrcp.f32 %v1010_v62 }
 0x396   : > { %2045 = vrot.lane.b32.xlu1 %v7441_v19, %s7259_s27 }
 0x398   : > { %v1016_v61 = vpop.xlane.xlu0 %1015 }
 0x399   : > { %6996 = vrcp.f32 %v1016_v61 }
 0x39a   : > { %2043 = vrot.lane.b32.xlu1 %v7441_v19, %s7260_s28 }
 0x39c   : > { %v1022_v63 = vpop.xlane.xlu0 %1021 }
 0x39d   : > { %6998 = vrcp.f32 %v1022_v63 }
 0x39e   : > { %2201 = vrot.lane.b32.xlu1 %v7447_v21, %s7259_s27  ;;  %s7190_s27 = scalar_lea.vmem %s7189_s26, 256 }
 0x39f   : > { %v6995_v0 = vpop.eup %6994 }
 0x3a0   : > { %v1028_v1 = vpop.xlane.xlu0 %1027  ;;  %v1038_v2 = vmul.f32 %v6995_v0, %v7542_v23 }
 0x3a1   : > { %7000 = vrcp.f32 %v1028_v1 }
 0x3a2   : > { %2199 = vrot.lane.b32.xlu1 %v7447_v21, %s7260_s28  ;;  %6606 = vmatmul.mubr.msk.f32.vlgmr.msra.gmra.mrb[16].mxu0 %vm335_vm2, %v1038_v2 }
 0x3a3   : > { %v6997_v3 = vpop.eup %6996  ;;  %6614 = vmatpush3.msra.mxu0 %v1274_v46  ;;  %6615 = vmatprep.mubr.msk.f32.mxu0 %vm7256_vm1, %v7255_v14 }
 0x3a4   : > { %6623 = vmatprep.subr.mxu0 %v7255_v14  ;;  %v1040_v5 = vmul.f32 %v6997_v3, %v7548_v27 }
 0x3a6   : > { %6616 = vmatmul.mubr.msk.f32.vlgmr.msra.gmra.mrb[18].mxu0 %vm335_vm2, %v1040_v5 }
 0x3a7   : > { %v6999_v6 = vpop.eup %6998  ;;  %6624 = vmatpush3.msra.mxu0 %v1426_v47  ;;  %6625 = vmatprep.mubr.msk.f32.mxu0 %vm7256_vm1, %v7255_v14 }
 0x3a8   : > { %6633 = vmatprep.subr.mxu0 %v7255_v14  ;;  %v1042_v8 = vmul.f32 %v6999_v6, %v7553_v31  ;;  %v1810_v31 = vpop.permute.xlu0 %1809 }
 0x3a9   : > { %v1007_v7 = vpop.xlane.xlu1 %1006 }
 0x3aa   : > { %7002 = vrcp.f32 %v1007_v7  ;;  %6626 = vmatmul.mubr.msk.f32.vlgmr.msra.gmra.mrb[20].mxu0 %vm335_vm2, %v1042_v8 }
 0x3ab   : > { %v7001_v9 = vpop.eup %7000  ;;  %6634 = vmatpush3.msra.mxu0 %v1578_v48  ;;  %6635 = vmatprep.mubr.msk.f32.mxu0 %vm7256_vm1, %v7255_v14 }
 0x3ac   : > { %v1044_v11 = vmul.f32 %v7001_v9, %v7557_v34  ;;  %6643 = vmatprep.subr.mxu0 %v7255_v14  ;;  %v1968_v34 = vpop.permute.xlu0 %1967 }
 0x3ad   : > { %v1013_v10 = vpop.xlane.xlu1 %1012 }
 0x3ae   : > { %7004 = vrcp.f32 %v1013_v10  ;;  %6636 = vmatmul.mubr.msk.f32.vlgmr.msra.gmra.mrb[22].mxu0 %vm335_vm2, %v1044_v11 }
 0x3af   : > { %6645 = vmatprep.mubr.msk.f32.mxu0 %vm7256_vm1, %v7255_v14 }
 0x3b2   : > { %6644 = vmatpush3.xpose.msk.msra.mxu0 %vm335_vm2, %v1734_v49 }
 0x3b3   : > { %6653 = vmatprep.subr.mxu0 %v7255_v14 }
 0x3b4   : > { %v7003_v12 = vpop.eup %7002 }
 0x3b5   : > { %v1037_v13 = vmul.f32 %v7003_v12, %v7561_v36  ;;  %6646 = vmatmul.mubr.msk.f32.vlgmr.msra.gmra.mrb[24].mxu0 %vm335_vm2, %v1732_v50 }
 0x3b6   : > { %6654 = vmatpush3.xpose.msk.msra.mxu0 %vm335_vm2, %v1890_v4  ;;  %6655 = vmatprep.mubr.msk.f32.mxu0 %vm7256_vm1, %v7255_v14 }
 0x3b7   : > { %6601 = vmatmul.mubr.msk.f32.vlgmr.msra.gmra.mrb[8].mxu1 %vm335_vm2, %v1037_v13  ;;  %6663 = vmatprep.subr.mxu0 %v7255_v14 }
 0x3b8   : > { %v7005_v23 = vpop.eup %7004  ;;  %6609 = vmatpush3.msra.mxu1 %v7586_v45  ;;  %6610 = vmatprep.mubr.msk.f32.mxu1 %vm7256_vm1, %v7255_v14 }
 0x3b9   : > { %6618 = vmatprep.subr.mxu1 %v7255_v14  ;;  %v1039_v24 = vmul.f32 %v7005_v23, %v7565_v38  ;;  %v1966_v38 = vpop.permute.xlu0 %1965 }
 0x3bb   : > { %6611 = vmatmul.mubr.msk.f32.vlgmr.msra.gmra.mrb[10].mxu1 %vm335_vm2, %v1039_v24 }
 0x3bc   : > { %6619 = vmatpush3.msra.mxu1 %v7589_v54  ;;  %6620 = vmatprep.mubr.msk.f32.mxu1 %vm7256_vm1, %v7255_v14 }
 0x3bd   : > { %6628 = vmatprep.subr.mxu1 %v7255_v14  ;;  %v2124_v39 = vpop.permute.xlu0 %2123 }
 0x3c1   : > { %v2122_v40 = vpop.permute.xlu0 %2121 }
 0x3c9   : > { %v1019_v25 = vpop.xlane.xlu1 %1018 }
 0x3ca   : > { %7006 = vrcp.f32 %v1019_v25 }
 0x3cd   : > { %v1888_v26 = vpop.permute.xlu1 %1887 }
 0x3ce   : > { %6656 = vmatmul.mubr.msk.f32.vlgmr.msra.gmra.mrb[26].mxu0 %vm335_vm2, %v1888_v26 }
 0x3cf   : > { %6665 = vmatprep.mubr.msk.f32.mxu0 %vm7256_vm1, %v7255_v14 }
 0x3d4   : > { %v7007_v27 = vpop.eup %7006 }
 0x3d5   : > { %v1041_v28 = vmul.f32 %v7007_v27, %v7578_v43 }
 0x3d7   : > { %6621 = vmatmul.mubr.msk.f32.vlgmr.msra.gmra.mrb[12].mxu1 %vm335_vm2, %v1041_v28 }
 0x3d8   : > { %6629 = vmatpush3.msra.mxu1 %v7591_v55  ;;  %6630 = vmatprep.mubr.msk.f32.mxu1 %vm7256_vm1, %v7255_v14 }
 0x3d9   : > { %6638 = vmatprep.subr.mxu1 %v7255_v14 }
 0x412   : > { %v1025_v29 = vpop.xlane.xlu1 %1024 }
 0x413   : > { %7008 = vrcp.f32 %v1025_v29 }
 0x416   : > { %v2046_v30 = vpop.permute.xlu1 %2045 }
 0x417   : > { %6664 = vmatpush3.xpose.msk.msra.mxu0 %vm335_vm2, %v2046_v30 }
 0x418   : > { %6673 = vmatprep.subr.mxu0 %v7255_v14 }
 0x41a   : > { %v2044_v32 = vpop.permute.xlu1 %2043 }
 0x41b   : > { %6666 = vmatmul.mubr.msk.f32.vlgmr.msra.gmra.mrb[28].mxu0 %vm335_vm2, %v2044_v32 }
 0x41c   : > { %6675 = vmatprep.mubr.msk.f32.mxu0 %vm7256_vm1, %v7255_v14 }
 0x41d   : > { %v7009_v33 = vpop.eup %7008 }
 0x41e   : > { %v2202_v35 = vpop.permute.xlu1 %2201  ;;  %v1043_v36 = vmul.f32 %v7009_v33, %v7593_v56 }
 0x41f   : > { %6674 = vmatpush3.xpose.msk.msra.mxu0 %vm335_vm2, %v2202_v35 }
 0x420   : > { %6631 = vmatmul.mubr.msk.f32.vlgmr.msra.gmra.mrb[14].mxu1 %vm335_vm2, %v1043_v36  ;;  %6683 = vmatprep.subr.mxu0 %v7255_v14 }
 0x421   : > { %6639 = vmatpush3.xpose.msk.msra.mxu1 %vm335_vm2, %v7597_v58  ;;  %6640 = vmatprep.mubr.msk.f32.mxu1 %vm7256_vm1, %v7255_v14 }
 0x422   : > { %v2200_v37 = vpop.permute.xlu1 %2199  ;;  %6648 = vmatprep.subr.mxu1 %v7255_v14 }
 0x423   : > { %6676 = vmatmul.mubr.msk.f32.vlgmr.msra.gmra.mrb[30].mxu0 %vm335_vm2, %v2200_v37 }
 0x424   : > { %6641 = vmatmul.mubr.msk.f32.vlgmr.msra.gmra.mrb[16].mxu1 %vm335_vm2, %v7599_v59  ;;  %6685 = vmatprep.mubr.msk.f32.mxu0 %vm7256_vm1, %v7255_v14 }
 0x425   : > { %6649 = vmatpush3.xpose.msk.msra.mxu1 %vm335_vm2, %v7601_v60  ;;  %6650 = vmatprep.mubr.msk.f32.mxu1 %vm7256_vm1, %v7255_v14 }
 0x426   : > { %6658 = vmatprep.subr.mxu1 %v7255_v14 }
 0x428   : > { %6651 = vmatmul.mubr.msk.f32.vlgmr.msra.gmra.mrb[18].mxu1 %vm335_vm2, %v1810_v31 }
 0x429   : > { %6659 = vmatpush3.xpose.msk.msra.mxu1 %vm335_vm2, %v1968_v34  ;;  %6660 = vmatprep.mubr.msk.f32.mxu1 %vm7256_vm1, %v7255_v14 }
 0x42a   : > { %6668 = vmatprep.subr.mxu1 %v7255_v14 }
 0x42c   : > { %6661 = vmatmul.mubr.msk.f32.vlgmr.msra.gmra.mrb[20].mxu1 %vm335_vm2, %v1966_v38 }
 0x42d   : > { %6669 = vmatpush3.xpose.msk.msra.mxu1 %vm335_vm2, %v2124_v39  ;;  %6670 = vmatprep.mubr.msk.f32.mxu1 %vm7256_vm1, %v7255_v14 }
 0x42e   : > { %6678 = vmatprep.subr.mxu1 %v7255_v14 }
 0x430   : > { %6671 = vmatmul.mubr.msk.f32.vlgmr.msra.gmra.mrb[22].mxu1 %vm335_vm2, %v2122_v40 }
 0x431   : > { %6680 = vmatprep.mubr.msk.f32.mxu1 %vm7256_vm1, %v7255_v14 }
 0x475   : > { %v7695_v41 = vpop.f32.mrb[16].mxu0 }
 0x476   : > { %v6607_v42 = vpop.f32.mrb[17].mxu0 }
 0x479   : > { %v7697_v43 = vpop.f32.mrb[18].mxu0 }
 0x47a   : > { %v6617_v44 = vpop.f32.mrb[19].mxu0 }
 0x47d   : > { %v7699_v45 = vpop.f32.mrb[20].mxu0 }
 0x47e   : > { %v6627_v46 = vpop.f32.mrb[21].mxu0 }
 0x481   : > { %v7701_v47 = vpop.f32.mrb[22].mxu0 }
 0x482   : > { %v6637_v48 = vpop.f32.mrb[23].mxu0 }
 0x488   : > { %v1805_v49 = vpop.f32.mrb[24].mxu0 }
 0x489   : > { %v2278_v50 = vmul.f32 0.35355338, %v1805_v49  ;;  %v6647_v51 = vpop.f32.mrb[25].mxu0 }
 0x48a   : > { %v7703_v52 = vpop.f32.mrb[8].mxu1 }
 0x48b   : > { %v6602_v53 = vpop.f32.mrb[9].mxu1  ;;  %v2288_v54 = vsel %vm335_vm2, %v2278_v50, -inf }
 0x48c   : > { %2289 = vmax.xlane.f32.xlu1 %v2288_v54 }
 0x48e   : > { %v7706_v55 = vpop.f32.mrb[10].mxu1 }
 0x48f   : > { %v6612_v56 = vpop.f32.mrb[11].mxu1 }
 0x4a1   : > { %v1961_v57 = vpop.f32.mrb[26].mxu0 }
 0x4a2   : > { %v6657_v58 = vpop.f32.mrb[27].mxu0  ;;  %v2280_v10 = vmul.f32 0.35355338, %v1961_v57 }
 0x4a4   : > { %v2294_v26 = vsel %vm335_vm2, %v2280_v10, -inf }
 0x4aa   : > { %v7708_v59 = vpop.f32.mrb[12].mxu1 }
 0x4ab   : > { %v6622_v60 = vpop.f32.mrb[13].mxu1 }
 0x4ee   : > { %v2117_v62 = vpop.f32.mrb[28].mxu0 }
 0x4ef   : > { %v6667_v61 = vpop.f32.mrb[29].mxu0  ;;  %v2282_v24 = vmul.f32 0.35355338, %v2117_v62 }
 0x4f1   : > { %v2300_v30 = vsel %vm335_vm2, %v2282_v24, -inf }
 0x4f3   : > { %v7710_v63 = vpop.f32.mrb[14].mxu1 }
 0x4f4   : > { %v6632_v0 = vpop.f32.mrb[15].mxu1 }
 0x4f6   : > { %v2273_v1 = vpop.f32.mrb[30].mxu0 }
 0x4f7   : > { %v1727_v2 = vpop.f32.mrb[16].mxu1  ;;  %v6677_v3 = vpop.f32.mrb[31].mxu0  ;;  %v2284_v29 = vmul.f32 0.35355338, %v2273_v1 }
 0x4f8   : > { %v2277_v4 = vmul.f32 0.35355338, %v1727_v2  ;;  %v6642_v5 = vpop.f32.mrb[17].mxu1 }
 0x4f9   : > { %v2306_v31 = vsel %vm335_vm2, %v2284_v29, -inf }
 0x4fa   : > { %v2285_v6 = vsel %vm335_vm2, %v2277_v4, -inf }
 0x4fb   : > { %2286 = vmax.xlane.f32.xlu0 %v2285_v6  ;;  %v1883_v7 = vpop.f32.mrb[18].mxu1 }
 0x4fc   : > { %v2279_v8 = vmul.f32 0.35355338, %v1883_v7  ;;  %v6652_v9 = vpop.f32.mrb[19].mxu1 }
 0x4fe   : > { %v2291_v11 = vsel %vm335_vm2, %v2279_v8, -inf }
 0x4ff   : > { %2292 = vmax.xlane.f32.xlu0 %v2291_v11  ;;  %v2039_v12 = vpop.f32.mrb[20].mxu1 }
 0x500   : > { %v2281_v13 = vmul.f32 0.35355338, %v2039_v12  ;;  %v6662_v23 = vpop.f32.mrb[21].mxu1 }
 0x502   : > { %v2297_v25 = vsel %vm335_vm2, %v2281_v13, -inf }
 0x503   : > { %v2195_v27 = vpop.f32.mrb[22].mxu1  ;;  %2298 = vmax.xlane.f32.xlu1 %v2297_v25  ;;  %2295 = vmax.xlane.f32.xlu0 %v2294_v26 }
 0x504   : > { %v6672_v28 = vpop.f32.mrb[23].mxu1  ;;  %v7726_v32 = vmul.f32 0.35355338, %v2195_v27 }
 0x506   : > { %v2303_v33 = vsel %vm335_vm2, %v7726_v32, -inf }
 0x507   : > { %2301 = vmax.xlane.f32.xlu0 %v2300_v30 }
 0x50b   : > { %2307 = vmax.xlane.f32.xlu0 %v2306_v31 }
 0x514   : > { %2373 = vrot.lane.b32.xlu1 %v7432_v16, %s7261_s29 }
 0x519   : > { %v2290_v34 = vpop.xlane.xlu1 %2289 }
 0x51a   : > { %v2310_v35 = vsub.f32 %v2278_v50, %v2290_v34 }
 0x51c   : > { %v2319_v36 = vmul.f32 1.442695, %v2310_v35 }
 0x51e   : > { %7010 = vpow2.f32 %v2319_v36 }
 0x521   : > { %2449 = vrot.lane.b32.xlu0 %v7429_v15, %s7261_s29 }
 0x525   : > { %2677 = vrot.lane.b32.xlu0 %v7444_v20, %s7261_s29 }
 0x528   : > { %v7734_v37 = vpop.eup %7010 }
 0x529   : > { %2829 = vrot.lane.b32.xlu0 %v7450_v22, %s7261_s29  ;;  %v2336_v38 = vsel %vm335_vm2, %v7734_v37, 0.0 }
 0x52d   : > { %2983 = vrot.lane.b32.xlu0 %v7432_v16, %s7262_s30 }
 0x531   : > { %2981 = vrot.lane.b32.xlu0 %v7432_v16, %s7263_s9 }
 0x535   : > { %3139 = vrot.lane.b32.xlu0 %v7437_v18, %s7262_s30 }
 0x538   : > { %2304 = vmax.xlane.f32.xlu1 %v2303_v33 }
 0x549   : > { %2525 = vrot.lane.b32.xlu1 %v7437_v18, %s7261_s29 }
 0x54d   : > { %2601 = vrot.lane.b32.xlu1 %v7435_v17, %s7261_s29 }
 0x551   : > { %2753 = vrot.lane.b32.xlu1 %v7441_v19, %s7261_s29 }
 0x554   : > { %2337 = vadd.xlane.f32.xlu0 %v2336_v38 }
 0x555   : > { %2905 = vrot.lane.b32.xlu1 %v7447_v21, %s7261_s29  ;;  %s7270_s29 = smov 24  }
 0x559   : > { %3061 = vrot.lane.b32.xlu1 %v7429_v15, %s7262_s30 }
 0x55d   : > { %3059 = vrot.lane.b32.xlu1 %v7429_v15, %s7263_s9 }
 0x561   : > { %3217 = vrot.lane.b32.xlu1 %v7435_v17, %s7262_s30 }
 0x588   : > { %v2287_v39 = vpop.xlane.xlu0 %2286 }
 0x589   : > { %v2309_v40 = vsub.f32 %v2277_v4, %v2287_v39 }
 0x58b   : > { %v2317_v42 = vmul.f32 1.442695, %v2309_v40 }
 0x58c   : > { %v2293_v44 = vpop.xlane.xlu0 %2292 }
 0x58d   : > { %7012 = vpow2.f32 %v2317_v42  ;;  %v2311_v46 = vsub.f32 %v2279_v8, %v2293_v44 }
 0x58f   : > { %v2321_v48 = vmul.f32 1.442695, %v2311_v46 }
 0x590   : > { %v2299_v49 = vpop.xlane.xlu1 %2298  ;;  %v2296_v50 = vpop.xlane.xlu0 %2295 }
 0x591   : > { %7014 = vpow2.f32 %v2321_v48  ;;  %v2313_v51 = vsub.f32 %v2281_v13, %v2299_v49  ;;  %v2312_v53 = vsub.f32 %v2280_v10, %v2296_v50 }
 0x593   : > { %v2325_v54 = vmul.f32 1.442695, %v2313_v51  ;;  %v2323_v56 = vmul.f32 1.442695, %v2312_v53 }
 0x594   : > { %v2374_v57 = vpop.permute.xlu1 %2373  ;;  %v2302_v58 = vpop.xlane.xlu0 %2301 }
 0x595   : > { %7016 = vpow2.f32 %v2325_v54  ;;  %v2314_v60 = vsub.f32 %v2282_v24, %v2302_v58  ;;  %6679 = vmatpush3.msra.mxu1 %v2374_v57 }
 0x596   : > { %7018 = vpow2.f32 %v2323_v56  ;;  %6688 = vmatprep.subr.mxu1 %v7255_v14 }
 0x597   : > { %v7747_v62 = vpop.eup %7012  ;;  %v2327_v61 = vmul.f32 1.442695, %v2314_v60 }
 0x598   : > { %v2308_v0 = vpop.xlane.xlu0 %2307  ;;  %v2333_v1 = vsel %vm335_vm2, %v7747_v62, 0.0 }
 0x599   : > { %7020 = vpow2.f32 %v2327_v61  ;;  %v2316_v2 = vsub.f32 %v2284_v29, %v2308_v0  ;;  %2334 = vadd.xlane.f32.xlu1 %v2333_v1 }
 0x59b   : > { %v7751_v3 = vpop.eup %7014  ;;  %v2331_v4 = vmul.f32 1.442695, %v2316_v2 }
 0x59c   : > { %v2450_v5 = vpop.permute.xlu0 %2449  ;;  %v2339_v6 = vsel %vm335_vm2, %v7751_v3, 0.0 }
 0x59d   : > { %7022 = vpow2.f32 %v2331_v4  ;;  %2340 = vadd.xlane.f32.xlu1 %v2339_v6  ;;  %6684 = vmatpush3.msra.mxu0 %v2450_v5 }
 0x59e   : > { %6693 = vmatprep.subr.mxu0 %v7255_v14 }
 0x59f   : > { %v7756_v7 = vpop.eup %7016 }
 0x5a0   : > { %v7758_v8 = vpop.eup %7018  ;;  %v2345_v9 = vsel %vm335_vm2, %v7756_v7, 0.0  ;;  %v7776_v24 = vpop.permute.xlu0 %2677 }
 0x5a1   : > { %2346 = vadd.xlane.f32.xlu1 %v2345_v9  ;;  %v2342_v10 = vsel %vm335_vm2, %v7758_v8, 0.0 }
 0x5a2   : > { %2343 = vadd.xlane.f32.xlu0 %v2342_v10 }
 0x5a3   : > { %v7764_v11 = vpop.eup %7020 }
 0x5a4   : > { %v2348_v12 = vsel %vm335_vm2, %v7764_v11, 0.0  ;;  %v7781_v28 = vpop.permute.xlu0 %2829 }
 0x5a6   : > { %2349 = vadd.xlane.f32.xlu0 %v2348_v12 }
 0x5a7   : > { %v7768_v13 = vpop.eup %7022 }
 0x5a8   : > { %v2354_v23 = vsel %vm335_vm2, %v7768_v13, 0.0  ;;  %v7787_v29 = vpop.permute.xlu0 %2983 }
 0x5aa   : > { %2355 = vadd.xlane.f32.xlu0 %v2354_v23 }
 0x5c0   : > { %3137 = vrot.lane.b32.xlu0 %v7437_v18, %s7263_s9 }
 0x5c4   : > { %3295 = vrot.lane.b32.xlu0 %v7444_v20, %s7262_s30 }
 0x5c5   : > { %v2305_v25 = vpop.xlane.xlu1 %2304 }
 0x5c6   : > { %v2315_v26 = vsub.f32 %v7726_v32, %v2305_v25  ;;  %v7795_v32 = vpop.permute.xlu0 %2981 }
 0x5c8   : > { %v2329_v27 = vmul.f32 1.442695, %v2315_v26  ;;  %3293 = vrot.lane.b32.xlu0 %v7444_v20, %s7263_s9 }
 0x5c9   : > { %v2526_v35 = vpop.permute.xlu1 %2525 }
 0x5ca   : > { %7024 = vpow2.f32 %v2329_v27  ;;  %v7801_v33 = vpop.permute.xlu0 %3139 }
 0x5cc   : > { %3451 = vrot.lane.b32.xlu0 %v7450_v22, %s7262_s30 }
 0x5cd   : > { %v2602_v39 = vpop.permute.xlu1 %2601 }
 0x5d0   : > { %3449 = vrot.lane.b32.xlu0 %v7450_v22, %s7263_s9 }
 0x5d4   : > { %v7789_v30 = vpop.eup %7024  ;;  %3777 = vrot.lane.b32.xlu0 %v7429_v15, %s7264_s10 }
 0x5d5   : > { %v2351_v31 = vsel %vm335_vm2, %v7789_v30, 0.0 }
 0x5d6   : > { %2352 = vadd.xlane.f32.xlu1 %v2351_v31 }
 0x5d8   : > { %4005 = vrot.lane.b32.xlu0 %v7444_v20, %s7264_s10 }
 0x5dc   : > { %4157 = vrot.lane.b32.xlu0 %v7450_v22, %s7264_s10 }
 0x5e0   : > { %4311 = vrot.lane.b32.xlu0 %v7432_v16, %s7265_s11 }
 0x5e1   : > { %v2338_v34 = vpop.xlane.xlu0 %2337 }
 0x5e2   : > { %7026 = vrcp.f32 %v2338_v34 }
 0x5e4   : > { %4309 = vrot.lane.b32.xlu0 %v7432_v16, %s7266_s4 }
 0x5e7   : > { %3215 = vrot.lane.b32.xlu1 %v7435_v17, %s7263_s9 }
 0x5eb   : > { %3373 = vrot.lane.b32.xlu1 %v7441_v19, %s7262_s30 }
 0x5ec   : > { %v7027_v36 = vpop.eup %7026 }
 0x5ed   : > { %v2366_v38 = vmul.f32 %v7027_v36, %v7734_v37  ;;  %v2754_v37 = vpop.permute.xlu1 %2753 }
 0x5ef   : > { %3371 = vrot.lane.b32.xlu1 %v7441_v19, %s7263_s9  ;;  %6686 = vmatmul.mubr.msk.f32.vlgmr.msra.gmra.mrb[32].mxu0 %vm335_vm2, %v2366_v38 }
 0x5f0   : > { %6694 = vmatpush3.msra.mxu0 %v2602_v39  ;;  %6695 = vmatprep.mubr.msk.f32.mxu0 %vm7256_vm1, %v7255_v14 }
 0x5f1   : > { %6703 = vmatprep.subr.mxu0 %v7255_v14  ;;  %v2906_v40 = vpop.permute.xlu1 %2905 }
 0x5f3   : > { %3529 = vrot.lane.b32.xlu1 %v7447_v21, %s7262_s30 }
 0x5f5   : > { %v3062_v42 = vpop.permute.xlu1 %3061 }
 0x5f7   : > { %3527 = vrot.lane.b32.xlu1 %v7447_v21, %s7263_s9 }
 0x5f9   : > { %v3060_v44 = vpop.permute.xlu1 %3059 }
 0x5fb   : > { %3701 = vrot.lane.b32.xlu1 %v7432_v16, %s7264_s10 }
 0x5fd   : > { %v3218_v46 = vpop.permute.xlu1 %3217 }
 0x5ff   : > { %3853 = vrot.lane.b32.xlu1 %v7437_v18, %s7264_s10 }
 0x603   : > { %3929 = vrot.lane.b32.xlu1 %v7435_v17, %s7264_s10 }
 0x607   : > { %4081 = vrot.lane.b32.xlu1 %v7441_v19, %s7264_s10 }
 0x60b   : > { %4233 = vrot.lane.b32.xlu1 %v7447_v21, %s7264_s10 }
 0x60f   : > { %4389 = vrot.lane.b32.xlu1 %v7429_v15, %s7265_s11 }
 0x613   : > { %4387 = vrot.lane.b32.xlu1 %v7429_v15, %s7266_s4 }
 0x626   : > { %v2335_v48 = vpop.xlane.xlu1 %2334 }
 0x627   : > { %7028 = vrcp.f32 %v2335_v48 }
 0x62a   : > { %v2341_v49 = vpop.xlane.xlu1 %2340 }
 0x62b   : > { %7030 = vrcp.f32 %v2341_v49 }
 0x62e   : > { %v2347_v50 = vpop.xlane.xlu1 %2346 }
 0x62f   : > { %7032 = vrcp.f32 %v2347_v50  ;;  %v2344_v51 = vpop.xlane.xlu0 %2343 }
 0x630   : > { %7034 = vrcp.f32 %v2344_v51 }
 0x631   : > { %v7029_v53 = vpop.eup %7028 }
 0x632   : > { %v2365_v54 = vmul.f32 %v7029_v53, %v7747_v62 }
 0x633   : > { %v2350_v56 = vpop.xlane.xlu0 %2349 }
 0x634   : > { %7036 = vrcp.f32 %v2350_v56  ;;  %6681 = vmatmul.mubr.msk.f32.vlgmr.msra.gmra.mrb[24].mxu1 %vm335_vm2, %v2365_v54 }
 0x635   : > { %v7031_v57 = vpop.eup %7030  ;;  %6689 = vmatpush3.msra.mxu1 %v2526_v35  ;;  %6690 = vmatprep.mubr.msk.f32.mxu1 %vm7256_vm1, %v7255_v14 }
 0x636   : > { %6698 = vmatprep.subr.mxu1 %v7255_v14  ;;  %v2367_v58 = vmul.f32 %v7031_v57, %v7751_v3 }
 0x637   : > { %v2356_v60 = vpop.xlane.xlu0 %2355 }
 0x638   : > { %7038 = vrcp.f32 %v2356_v60  ;;  %6691 = vmatmul.mubr.msk.f32.vlgmr.msra.gmra.mrb[26].mxu1 %vm335_vm2, %v2367_v58 }
 0x639   : > { %v7033_v61 = vpop.eup %7032  ;;  %6699 = vmatpush3.msra.mxu1 %v7776_v24  ;;  %6700 = vmatprep.mubr.msk.f32.mxu1 %vm7256_vm1, %v7255_v14 }
 0x63a   : > { %v7035_v62 = vpop.eup %7034  ;;  %6708 = vmatprep.subr.mxu1 %v7255_v14  ;;  %v2369_v0 = vmul.f32 %v7033_v61, %v7756_v7 }
 0x63b   : > { %v2368_v1 = vmul.f32 %v7035_v62, %v7758_v8  ;;  %v3138_v6 = vpop.permute.xlu0 %3137 }
 0x63c   : > { %6701 = vmatmul.mubr.msk.f32.vlgmr.msra.gmra.mrb[28].mxu1 %vm335_vm2, %v2369_v0 }
 0x63d   : > { %6696 = vmatmul.mubr.msk.f32.vlgmr.msra.gmra.mrb[34].mxu0 %vm335_vm2, %v2368_v1  ;;  %6709 = vmatpush3.msra.mxu1 %v7781_v28 }
 0x63e   : > { %v7037_v2 = vpop.eup %7036  ;;  %6704 = vmatpush3.msra.mxu0 %v2754_v37  ;;  %6705 = vmatprep.mubr.msk.f32.mxu0 %vm7256_vm1, %v7255_v14 }
 0x63f   : > { %6713 = vmatprep.subr.mxu0 %v7255_v14  ;;  %v2370_v3 = vmul.f32 %v7037_v2, %v7764_v11  ;;  %6710 = vmatprep.mubr.msk.f32.mxu1 %vm7256_vm1, %v7255_v14  ;;  %v3296_v7 = vpop.permute.xlu0 %3295 }
 0x640   : > { %6718 = vmatprep.subr.mxu1 %v7255_v14 }
 0x641   : > { %6706 = vmatmul.mubr.msk.f32.vlgmr.msra.gmra.mrb[36].mxu0 %vm335_vm2, %v2370_v3 }
 0x642   : > { %v7039_v4 = vpop.eup %7038  ;;  %6714 = vmatpush3.msra.mxu0 %v2906_v40  ;;  %6715 = vmatprep.mubr.msk.f32.mxu0 %vm7256_vm1, %v7255_v14 }
 0x643   : > { %v2372_v5 = vmul.f32 %v7039_v4, %v7768_v13  ;;  %6723 = vmatprep.subr.mxu0 %v7255_v14  ;;  %v3294_v9 = vpop.permute.xlu0 %3293 }
 0x645   : > { %6716 = vmatmul.mubr.msk.f32.vlgmr.msra.gmra.mrb[38].mxu0 %vm335_vm2, %v2372_v5 }
 0x646   : > { %6725 = vmatprep.mubr.msk.f32.mxu0 %vm7256_vm1, %v7255_v14 }
 0x647   : > { %v3452_v12 = vpop.permute.xlu0 %3451 }
 0x649   : > { %6724 = vmatpush3.xpose.msk.msra.mxu0 %vm335_vm2, %v3062_v42 }
 0x64a   : > { %6733 = vmatprep.subr.mxu0 %v7255_v14 }
 0x64b   : > { %v3450_v25 = vpop.permute.xlu0 %3449 }
 0x64c   : > { %6726 = vmatmul.mubr.msk.f32.vlgmr.msra.gmra.mrb[40].mxu0 %vm335_vm2, %v3060_v44 }
 0x64d   : > { %6734 = vmatpush3.xpose.msk.msra.mxu0 %vm335_vm2, %v3218_v46  ;;  %6735 = vmatprep.mubr.msk.f32.mxu0 %vm7256_vm1, %v7255_v14 }
 0x64e   : > { %6743 = vmatprep.subr.mxu0 %v7255_v14 }
 0x64f   : > { %v3778_v28 = vpop.permute.xlu0 %3777 }
 0x663   : > { %v2353_v8 = vpop.xlane.xlu1 %2352 }
 0x664   : > { %7040 = vrcp.f32 %v2353_v8 }
 0x667   : > { %v3216_v10 = vpop.permute.xlu1 %3215 }
 0x668   : > { %6736 = vmatmul.mubr.msk.f32.vlgmr.msra.gmra.mrb[42].mxu0 %vm335_vm2, %v3216_v10 }
 0x669   : > { %6745 = vmatprep.mubr.msk.f32.mxu0 %vm7256_vm1, %v7255_v14 }
 0x66b   : > { %v3374_v11 = vpop.permute.xlu1 %3373 }
 0x66c   : > { %6744 = vmatpush3.xpose.msk.msra.mxu0 %vm335_vm2, %v3374_v11 }
 0x66d   : > { %6753 = vmatprep.subr.mxu0 %v7255_v14 }
 0x66e   : > { %v7041_v13 = vpop.eup %7040 }
 0x66f   : > { %v3372_v23 = vpop.permute.xlu1 %3371  ;;  %v2371_v24 = vmul.f32 %v7041_v13, %v7789_v30 }
 0x670   : > { %6746 = vmatmul.mubr.msk.f32.vlgmr.msra.gmra.mrb[44].mxu0 %vm335_vm2, %v3372_v23 }
 0x671   : > { %6711 = vmatmul.mubr.msk.f32.vlgmr.msra.gmra.mrb[30].mxu1 %vm335_vm2, %v2371_v24  ;;  %6755 = vmatprep.mubr.msk.f32.mxu0 %vm7256_vm1, %v7255_v14 }
 0x672   : > { %6719 = vmatpush3.xpose.msk.msra.mxu1 %vm335_vm2, %v7787_v29  ;;  %6720 = vmatprep.mubr.msk.f32.mxu1 %vm7256_vm1, %v7255_v14 }
 0x673   : > { %v3530_v26 = vpop.permute.xlu1 %3529  ;;  %6728 = vmatprep.subr.mxu1 %v7255_v14 }
 0x674   : > { %6754 = vmatpush3.xpose.msk.msra.mxu0 %vm335_vm2, %v3530_v26 }
 0x675   : > { %6721 = vmatmul.mubr.msk.f32.vlgmr.msra.gmra.mrb[32].mxu1 %vm335_vm2, %v7795_v32  ;;  %6763 = vmatprep.subr.mxu0 %v7255_v14 }
 0x676   : > { %6729 = vmatpush3.xpose.msk.msra.mxu1 %vm335_vm2, %v7801_v33  ;;  %6730 = vmatprep.mubr.msk.f32.mxu1 %vm7256_vm1, %v7255_v14 }
 0x677   : > { %v3528_v27 = vpop.permute.xlu1 %3527  ;;  %6738 = vmatprep.subr.mxu1 %v7255_v14 }
 0x678   : > { %6756 = vmatmul.mubr.msk.f32.vlgmr.msra.gmra.mrb[46].mxu0 %vm335_vm2, %v3528_v27 }
 0x679   : > { %6764 = vmatpush3.msra.mxu0 %v3778_v28  ;;  %6731 = vmatmul.mubr.msk.f32.vlgmr.msra.gmra.mrb[34].mxu1 %vm335_vm2, %v3138_v6 }
 0x67a   : > { %6739 = vmatpush3.xpose.msk.msra.mxu1 %vm335_vm2, %v3296_v7  ;;  %6740 = vmatprep.mubr.msk.f32.mxu1 %vm7256_vm1, %v7255_v14 }
 0x67b   : > { %6748 = vmatprep.subr.mxu1 %v7255_v14  ;;  %6765 = vmatprep.mubr.msk.f32.mxu0 %vm7256_vm1, %v7255_v14  ;;  %v3702_v29 = vpop.permute.xlu1 %3701 }
 0x67c   : > { %6773 = vmatprep.subr.mxu0 %v7255_v14 }
 0x67d   : > { %6741 = vmatmul.mubr.msk.f32.vlgmr.msra.gmra.mrb[36].mxu1 %vm335_vm2, %v3294_v9 }
 0x67e   : > { %6749 = vmatpush3.xpose.msk.msra.mxu1 %vm335_vm2, %v3452_v12  ;;  %6750 = vmatprep.mubr.msk.f32.mxu1 %vm7256_vm1, %v7255_v14 }
 0x67f   : > { %6758 = vmatprep.subr.mxu1 %v7255_v14 }
 0x681   : > { %6751 = vmatmul.mubr.msk.f32.vlgmr.msra.gmra.mrb[38].mxu1 %vm335_vm2, %v3450_v25 }
 0x682   : > { %6759 = vmatpush3.msra.mxu1 %v3702_v29  ;;  %6760 = vmatprep.mubr.msk.f32.mxu1 %vm7256_vm1, %v7255_v14 }
 0x683   : > { %6768 = vmatprep.subr.mxu1 %v7255_v14 }
 0x6c2   : > { %v7916_v30 = vpop.f32.mrb[32].mxu0 }
 0x6c3   : > { %v6687_v31 = vpop.f32.mrb[33].mxu0 }
 0x707   : > { %v7918_v32 = vpop.f32.mrb[24].mxu1 }
 0x708   : > { %v6682_v33 = vpop.f32.mrb[25].mxu1 }
 0x709   : > { %v7950_v33 = vpop.permute.xlu1 %3853 }
 0x70b   : > { %v7920_v34 = vpop.f32.mrb[26].mxu1 }
 0x70c   : > { %v6692_v35 = vpop.f32.mrb[27].mxu1 }
 0x70d   : > { %v7952_v35 = vpop.permute.xlu1 %3929 }
 0x70f   : > { %v7922_v36 = vpop.f32.mrb[28].mxu1 }
 0x710   : > { %v7924_v38 = vpop.f32.mrb[34].mxu0  ;;  %v6702_v39 = vpop.f32.mrb[29].mxu1 }
 0x711   : > { %v6697_v37 = vpop.f32.mrb[35].mxu0  ;;  %v7954_v39 = vpop.permute.xlu1 %4081 }
 0x714   : > { %v7926_v40 = vpop.f32.mrb[36].mxu0 }
 0x715   : > { %v6707_v42 = vpop.f32.mrb[37].mxu0  ;;  %v7956_v37 = vpop.permute.xlu1 %4233 }
 0x718   : > { %v7928_v44 = vpop.f32.mrb[38].mxu0 }
 0x719   : > { %v6717_v46 = vpop.f32.mrb[39].mxu0  ;;  %v7958_v42 = vpop.permute.xlu1 %4389 }
 0x71d   : > { %v7960_v46 = vpop.permute.xlu1 %4387 }
 0x71f   : > { %v3133_v48 = vpop.f32.mrb[40].mxu0 }
 0x720   : > { %v3606_v49 = vmul.f32 0.35355338, %v3133_v48  ;;  %v6727_v50 = vpop.f32.mrb[41].mxu0 }
 0x722   : > { %v3616_v51 = vsel %vm335_vm2, %v3606_v49, -inf }
 0x723   : > { %3617 = vmax.xlane.f32.xlu1 %v3616_v51 }
 0x73b   : > { %v3289_v53 = vpop.f32.mrb[42].mxu0 }
 0x73c   : > { %v6737_v54 = vpop.f32.mrb[43].mxu0  ;;  %v3608_v7 = vmul.f32 0.35355338, %v3289_v53 }
 0x73e   : > { %v3622_v23 = vsel %vm335_vm2, %v3608_v7, -inf }
 0x743   : > { %v3445_v56 = vpop.f32.mrb[44].mxu0 }
 0x744   : > { %v7931_v57 = vpop.f32.mrb[30].mxu1  ;;  %v6747_v58 = vpop.f32.mrb[45].mxu0  ;;  %v3610_v12 = vmul.f32 0.35355338, %v3445_v56 }
 0x745   : > { %v6712_v60 = vpop.f32.mrb[31].mxu1  ;;  %v7966_v56 = vpop.permute.xlu0 %4005 }
 0x746   : > { %v3628_v29 = vsel %vm335_vm2, %v3610_v12, -inf }
 0x748   : > { %v3055_v61 = vpop.f32.mrb[32].mxu1 }
 0x749   : > { %v3605_v62 = vmul.f32 0.35355338, %v3055_v61  ;;  %v6722_v0 = vpop.f32.mrb[33].mxu1  ;;  %v7968_v58 = vpop.permute.xlu0 %4157 }
 0x74b   : > { %v3601_v1 = vpop.f32.mrb[46].mxu0  ;;  %v3613_v2 = vsel %vm335_vm2, %v3605_v62, -inf }
 0x74c   : > { %3614 = vmax.xlane.f32.xlu0 %v3613_v2  ;;  %v3211_v3 = vpop.f32.mrb[34].mxu1  ;;  %v6757_v4 = vpop.f32.mrb[47].mxu0  ;;  %v7939_v27 = vmul.f32 0.35355338, %v3601_v1 }
 0x74d   : > { %v3607_v5 = vmul.f32 0.35355338, %v3211_v3  ;;  %v6732_v6 = vpop.f32.mrb[35].mxu1  ;;  %v7970_v60 = vpop.permute.xlu0 %4311 }
 0x74e   : > { %v3634_v31 = vsel %vm335_vm2, %v7939_v27, -inf }
 0x74f   : > { %v3619_v8 = vsel %vm335_vm2, %v3607_v5, -inf }
 0x750   : > { %3620 = vmax.xlane.f32.xlu0 %v3619_v8  ;;  %v3367_v9 = vpop.f32.mrb[36].mxu1 }
 0x751   : > { %v3609_v10 = vmul.f32 0.35355338, %v3367_v9  ;;  %v6742_v11 = vpop.f32.mrb[37].mxu1  ;;  %v7972_v61 = vpop.permute.xlu0 %4309 }
 0x753   : > { %v3625_v13 = vsel %vm335_vm2, %v3609_v10, -inf }
 0x754   : > { %v3523_v24 = vpop.f32.mrb[38].mxu1  ;;  %3626 = vmax.xlane.f32.xlu1 %v3625_v13  ;;  %3623 = vmax.xlane.f32.xlu0 %v3622_v23 }
 0x755   : > { %v7937_v25 = vmul.f32 0.35355338, %v3523_v24  ;;  %v6752_v26 = vpop.f32.mrb[39].mxu1 }
 0x757   : > { %v3631_v28 = vsel %vm335_vm2, %v7937_v25, -inf }
 0x758   : > { %3632 = vmax.xlane.f32.xlu1 %v3631_v28  ;;  %3629 = vmax.xlane.f32.xlu0 %v3628_v29 }
 0x75c   : > { %3635 = vmax.xlane.f32.xlu0 %v3634_v31 }
 0x769   : > { %4545 = vrot.lane.b32.xlu1 %v7435_v17, %s7265_s11 }
 0x772   : > { %4467 = vrot.lane.b32.xlu0 %v7437_v18, %s7265_s11 }
 0x7b0   : > { %v3618_v48 = vpop.xlane.xlu1 %3617 }
 0x7b1   : > { %v3638_v50 = vsub.f32 %v3606_v49, %v3618_v48 }
 0x7b3   : > { %v3647_v51 = vmul.f32 1.442695, %v3638_v50 }
 0x7b5   : > { %7042 = vpow2.f32 %v3647_v51 }
 0x7bf   : > { %v7962_v53 = vpop.eup %7042 }
 0x7c0   : > { %v3664_v54 = vsel %vm335_vm2, %v7962_v53, 0.0 }
 0x7c1   : > { %3665 = vadd.xlane.f32.xlu0 %v3664_v54 }
 0x7d9   : > { %v3615_v0 = vpop.xlane.xlu0 %3614 }
 0x7da   : > { %v3637_v1 = vsub.f32 %v3605_v62, %v3615_v0 }
 0x7dc   : > { %v3645_v2 = vmul.f32 1.442695, %v3637_v1 }
 0x7dd   : > { %v3621_v49 = vpop.xlane.xlu0 %3620 }
 0x7de   : > { %7044 = vpow2.f32 %v3645_v2  ;;  %v3639_v3 = vsub.f32 %v3607_v5, %v3621_v49 }
 0x7e0   : > { %v3649_v4 = vmul.f32 1.442695, %v3639_v3 }
 0x7e1   : > { %v3627_v6 = vpop.xlane.xlu1 %3626  ;;  %v3624_v8 = vpop.xlane.xlu0 %3623 }
 0x7e2   : > { %7046 = vpow2.f32 %v3649_v4  ;;  %v3641_v9 = vsub.f32 %v3609_v10, %v3627_v6  ;;  %v3640_v11 = vsub.f32 %v3608_v7, %v3624_v8 }
 0x7e4   : > { %v3653_v13 = vmul.f32 1.442695, %v3641_v9  ;;  %v3651_v23 = vmul.f32 1.442695, %v3640_v11 }
 0x7e5   : > { %v3630_v24 = vpop.xlane.xlu0 %3629  ;;  %v3633_v54 = vpop.xlane.xlu1 %3632 }
 0x7e6   : > { %7048 = vpow2.f32 %v3653_v13  ;;  %v3642_v26 = vsub.f32 %v3610_v12, %v3630_v24  ;;  %v3643_v0 = vsub.f32 %v7937_v25, %v3633_v54 }
 0x7e7   : > { %7050 = vpow2.f32 %v3651_v23 }
 0x7e8   : > { %v7045_v28 = vpop.eup %7044  ;;  %v3655_v29 = vmul.f32 1.442695, %v3642_v26  ;;  %v3657_v2 = vmul.f32 1.442695, %v3643_v0 }
 0x7e9   : > { %v3661_v62 = vsel %vm335_vm2, %v7045_v28, 0.0  ;;  %v3636_v1 = vpop.xlane.xlu0 %3635  ;;  %v8026_v23 = vpop.permute.xlu1 %4545 }
 0x7ea   : > { %3662 = vadd.xlane.f32.xlu1 %v3661_v62  ;;  %7052 = vpow2.f32 %v3655_v29  ;;  %v3644_v49 = vsub.f32 %v7939_v27, %v3636_v1 }
 0x7eb   : > { %7054 = vpow2.f32 %v3657_v2 }
 0x7ec   : > { %v7047_v31 = vpop.eup %7046  ;;  %v3659_v3 = vmul.f32 1.442695, %v3644_v49 }
 0x7ed   : > { %v3667_v5 = vsel %vm335_vm2, %v7047_v31, 0.0  ;;  %v8014_v25 = vpop.permute.xlu0 %4467 }
 0x7ee   : > { %3668 = vadd.xlane.f32.xlu1 %v3667_v5  ;;  %7056 = vpow2.f32 %v3659_v3 }
 0x7f0   : > { %v7976_v48 = vpop.eup %7048 }
 0x7f1   : > { %v7978_v10 = vpop.eup %7050  ;;  %v3673_v7 = vsel %vm335_vm2, %v7976_v48, 0.0 }
 0x7f2   : > { %3674 = vadd.xlane.f32.xlu1 %v3673_v7  ;;  %v3670_v12 = vsel %vm335_vm2, %v7978_v10, 0.0 }
 0x7f3   : > { %3671 = vadd.xlane.f32.xlu0 %v3670_v12 }
 0x7f4   : > { %v7984_v50 = vpop.eup %7052 }
 0x7f5   : > { %v3676_v51 = vsel %vm335_vm2, %v7984_v50, 0.0  ;;  %v7994_v4 = vpop.eup %7054 }
 0x7f6   : > { %v3679_v6 = vsel %vm335_vm2, %v7994_v4, 0.0 }
 0x7f7   : > { %3677 = vadd.xlane.f32.xlu0 %v3676_v51 }
 0x7f8   : > { %v7998_v8 = vpop.eup %7056 }
 0x7f9   : > { %v3682_v9 = vsel %vm335_vm2, %v7998_v8, 0.0 }
 0x803   : > { %4543 = vrot.lane.b32.xlu1 %v7435_v17, %s7266_s4 }
 0x80d   : > { %4465 = vrot.lane.b32.xlu0 %v7437_v18, %s7266_s4 }
 0x827   : > { %3680 = vadd.xlane.f32.xlu1 %v3679_v6 }
 0x82c   : > { %3683 = vadd.xlane.f32.xlu0 %v3682_v9 }
 0x838   : > { %4701 = vrot.lane.b32.xlu1 %v7441_v19, %s7265_s11 }
 0x83c   : > { %4699 = vrot.lane.b32.xlu1 %v7441_v19, %s7266_s4 }
 0x840   : > { %4857 = vrot.lane.b32.xlu1 %v7447_v21, %s7265_s11 }
 0x842   : > { %4623 = vrot.lane.b32.xlu0 %v7444_v20, %s7265_s11 }
 0x844   : > { %4855 = vrot.lane.b32.xlu1 %v7447_v21, %s7266_s4 }
 0x846   : > { %4621 = vrot.lane.b32.xlu0 %v7444_v20, %s7266_s4 }
 0x84a   : > { %4779 = vrot.lane.b32.xlu0 %v7450_v22, %s7265_s11 }
 0x84e   : > { %v3666_v27 = vpop.xlane.xlu0 %3665  ;;  %4777 = vrot.lane.b32.xlu0 %v7450_v22, %s7266_s4  ;;  %s6266_s4 = sshll.u32 %s7395_s5, 3 }
 0x84f   : > { %7058 = vrcp.f32 %v3666_v27 }
 0x859   : > { %v7059_v11 = vpop.eup %7058 }
 0x85a   : > { %v3694_v13 = vmul.f32 %v7059_v11, %v7962_v53 }
 0x85c   : > { %6766 = vmatmul.mubr.msk.f32.vlgmr.msra.gmra.mrb[48].mxu0 %vm335_vm2, %v3694_v13 }
 0x85d   : > { %6774 = vmatpush3.msra.mxu0 %v7952_v35  ;;  %6775 = vmatprep.mubr.msk.f32.mxu0 %vm7256_vm1, %v7255_v14 }
 0x85e   : > { %6783 = vmatprep.subr.mxu0 %v7255_v14 }
 0x877   : > { %v3663_v24 = vpop.xlane.xlu1 %3662 }
 0x878   : > { %7060 = vrcp.f32 %v3663_v24 }
 0x87b   : > { %v3669_v26 = vpop.xlane.xlu1 %3668 }
 0x87c   : > { %7062 = vrcp.f32 %v3669_v26 }
 0x87f   : > { %v3675_v29 = vpop.xlane.xlu1 %3674 }
 0x880   : > { %7064 = vrcp.f32 %v3675_v29  ;;  %v3672_v62 = vpop.xlane.xlu0 %3671 }
 0x881   : > { %7066 = vrcp.f32 %v3672_v62 }
 0x882   : > { %v7061_v53 = vpop.eup %7060 }
 0x883   : > { %v3693_v5 = vmul.f32 %v7061_v53, %v7045_v28 }
 0x884   : > { %v3678_v7 = vpop.xlane.xlu0 %3677 }
 0x885   : > { %7068 = vrcp.f32 %v3678_v7  ;;  %6761 = vmatmul.mubr.msk.f32.vlgmr.msra.gmra.mrb[40].mxu1 %vm335_vm2, %v3693_v5 }
 0x886   : > { %v7063_v35 = vpop.eup %7062  ;;  %6769 = vmatpush3.msra.mxu1 %v7950_v33  ;;  %6770 = vmatprep.mubr.msk.f32.mxu1 %vm7256_vm1, %v7255_v14 }
 0x887   : > { %v3695_v12 = vmul.f32 %v7063_v35, %v7047_v31  ;;  %6778 = vmatprep.subr.mxu1 %v7255_v14 }
 0x889   : > { %6771 = vmatmul.mubr.msk.f32.vlgmr.msra.gmra.mrb[42].mxu1 %vm335_vm2, %v3695_v12 }
 0x88a   : > { %v7065_v51 = vpop.eup %7064  ;;  %6779 = vmatpush3.msra.mxu1 %v7966_v56  ;;  %6780 = vmatprep.mubr.msk.f32.mxu1 %vm7256_vm1, %v7255_v14 }
 0x88b   : > { %v7067_v28 = vpop.eup %7066  ;;  %v3697_v54 = vmul.f32 %v7065_v51, %v7976_v48  ;;  %6788 = vmatprep.subr.mxu1 %v7255_v14  ;;  %v4466_v48 = vpop.permute.xlu0 %4465 }
 0x88c   : > { %v3696_v33 = vmul.f32 %v7067_v28, %v7978_v10 }
 0x88d   : > { %6781 = vmatmul.mubr.msk.f32.vlgmr.msra.gmra.mrb[44].mxu1 %vm335_vm2, %v3697_v54 }
 0x88e   : > { %6776 = vmatmul.mubr.msk.f32.vlgmr.msra.gmra.mrb[50].mxu0 %vm335_vm2, %v3696_v33  ;;  %6789 = vmatpush3.msra.mxu1 %v7968_v58 }
 0x88f   : > { %v7069_v31 = vpop.eup %7068  ;;  %6784 = vmatpush3.msra.mxu0 %v7954_v39  ;;  %6785 = vmatprep.mubr.msk.f32.mxu0 %vm7256_vm1, %v7255_v14  ;;  %v4544_v39 = vpop.permute.xlu1 %4543 }
 0x890   : > { %v3698_v56 = vmul.f32 %v7069_v31, %v7984_v50  ;;  %6793 = vmatprep.subr.mxu0 %v7255_v14  ;;  %6790 = vmatprep.mubr.msk.f32.mxu1 %vm7256_vm1, %v7255_v14 }
 0x891   : > { %6798 = vmatprep.subr.mxu1 %v7255_v14 }
 0x892   : > { %6786 = vmatmul.mubr.msk.f32.vlgmr.msra.gmra.mrb[52].mxu0 %vm335_vm2, %v3698_v56 }
 0x893   : > { %6794 = vmatpush3.msra.mxu0 %v7956_v37  ;;  %6795 = vmatprep.mubr.msk.f32.mxu0 %vm7256_vm1, %v7255_v14 }
 0x894   : > { %6803 = vmatprep.subr.mxu0 %v7255_v14 }
 0x8b4   : > { %v3681_v58 = vpop.xlane.xlu1 %3680 }
 0x8b5   : > { %7070 = vrcp.f32 %v3681_v58 }
 0x8b8   : > { %v4702_v2 = vpop.permute.xlu1 %4701 }
 0x8b9   : > { %v3684_v10 = vpop.xlane.xlu0 %3683 }
 0x8ba   : > { %7072 = vrcp.f32 %v3684_v10 }
 0x8bd   : > { %v4624_v0 = vpop.permute.xlu0 %4623 }
 0x8bf   : > { %v7071_v50 = vpop.eup %7070 }
 0x8c0   : > { %v3699_v1 = vmul.f32 %v7071_v50, %v7994_v4 }
 0x8c1   : > { %v4622_v3 = vpop.permute.xlu0 %4621 }
 0x8c2   : > { %6791 = vmatmul.mubr.msk.f32.vlgmr.msra.gmra.mrb[46].mxu1 %vm335_vm2, %v3699_v1 }
 0x8c3   : > { %6799 = vmatpush3.xpose.msk.msra.mxu1 %vm335_vm2, %v7970_v60  ;;  %6800 = vmatprep.mubr.msk.f32.mxu1 %vm7256_vm1, %v7255_v14  ;;  %v4700_v60 = vpop.permute.xlu1 %4699 }
 0x8c4   : > { %v7073_v37 = vpop.eup %7072  ;;  %6808 = vmatprep.subr.mxu1 %v7255_v14 }
 0x8c5   : > { %v3700_v49 = vmul.f32 %v7073_v37, %v7998_v8 }
 0x8c6   : > { %6801 = vmatmul.mubr.msk.f32.vlgmr.msra.gmra.mrb[48].mxu1 %vm335_vm2, %v7972_v61  ;;  %v4780_v61 = vpop.permute.xlu0 %4779 }
 0x8c7   : > { %6796 = vmatmul.mubr.msk.f32.vlgmr.msra.gmra.mrb[54].mxu0 %vm335_vm2, %v3700_v49  ;;  %6809 = vmatpush3.xpose.msk.msra.mxu1 %vm335_vm2, %v8014_v25 }
 0x8c8   : > { %6804 = vmatpush3.xpose.msk.msra.mxu0 %vm335_vm2, %v7958_v42  ;;  %6805 = vmatprep.mubr.msk.f32.mxu0 %vm7256_vm1, %v7255_v14  ;;  %v4858_v42 = vpop.permute.xlu1 %4857 }
 0x8c9   : > { %6810 = vmatprep.mubr.msk.f32.mxu1 %vm7256_vm1, %v7255_v14  ;;  %6813 = vmatprep.subr.mxu0 %v7255_v14 }
 0x8ca   : > { %6818 = vmatprep.subr.mxu1 %v7255_v14  ;;  %6811 = vmatmul.mubr.msk.f32.vlgmr.msra.gmra.mrb[50].mxu1 %vm335_vm2, %v4466_v48 }
 0x8cb   : > { %6806 = vmatmul.mubr.msk.f32.vlgmr.msra.gmra.mrb[56].mxu0 %vm335_vm2, %v7960_v46  ;;  %6819 = vmatpush3.xpose.msk.msra.mxu1 %vm335_vm2, %v4624_v0  ;;  %v4778_v46 = vpop.permute.xlu0 %4777 }
 0x8cc   : > { %6814 = vmatpush3.xpose.msk.msra.mxu0 %vm335_vm2, %v8026_v23  ;;  %6815 = vmatprep.mubr.msk.f32.mxu0 %vm7256_vm1, %v7255_v14  ;;  %v4856_v4 = vpop.permute.xlu1 %4855 }
 0x8cd   : > { %6820 = vmatprep.mubr.msk.f32.mxu1 %vm7256_vm1, %v7255_v14  ;;  %6823 = vmatprep.subr.mxu0 %v7255_v14 }
 0x8ce   : > { %6828 = vmatprep.subr.mxu1 %v7255_v14  ;;  %6821 = vmatmul.mubr.msk.f32.vlgmr.msra.gmra.mrb[52].mxu1 %vm335_vm2, %v4622_v3 }
 0x8cf   : > { %6816 = vmatmul.mubr.msk.f32.vlgmr.msra.gmra.mrb[58].mxu0 %vm335_vm2, %v4544_v39  ;;  %6829 = vmatpush3.xpose.msk.msra.mxu1 %vm335_vm2, %v4780_v61 }
 0x8d0   : > { %6824 = vmatpush3.xpose.msk.msra.mxu0 %vm335_vm2, %v4702_v2  ;;  %6825 = vmatprep.mubr.msk.f32.mxu0 %vm7256_vm1, %v7255_v14 }
 0x8d1   : > { %6830 = vmatprep.mubr.msk.f32.mxu1 %vm7256_vm1, %v7255_v14  ;;  %6833 = vmatprep.subr.mxu0 %v7255_v14 }
 0x8d2   : > { %6831 = vmatmul.mubr.msk.f32.vlgmr.msra.gmra.mrb[54].mxu1 %vm335_vm2, %v4778_v46  ;;  %6838 = vmatprep.subr.mxu1 %v7255_v14 }
 0x8d3   : > { %6826 = vmatmul.mubr.msk.f32.vlgmr.msra.gmra.mrb[60].mxu0 %vm335_vm2, %v4700_v60  ;;  %6840 = vmatprep.mubr.msk.f32.mxu1 %vm7256_vm1, %v7255_v14 }
 0x8d4   : > { %6834 = vmatpush3.xpose.msk.msra.mxu0 %vm335_vm2, %v4858_v42  ;;  %6835 = vmatprep.mubr.msk.f32.mxu0 %vm7256_vm1, %v7255_v14 }
 0x8d5   : > { %6843 = vmatprep.subr.mxu0 %v7255_v14 }
 0x8d7   : > { %6836 = vmatmul.mubr.msk.f32.vlgmr.msra.gmra.mrb[62].mxu0 %vm335_vm2, %v4856_v4 }
 0x8d8   : > { %6845 = vmatprep.mubr.msk.f32.mxu0 %vm7256_vm1, %v7255_v14 }
 0x92f   : > { %v8110_v6 = vpop.f32.mrb[48].mxu0 }
 0x930   : > { %v6767_v8 = vpop.f32.mrb[49].mxu0 }
 0x958   : > { %v8112_v9 = vpop.f32.mrb[40].mxu1 }
 0x959   : > { %v6762_v25 = vpop.f32.mrb[41].mxu1 }
 0x95c   : > { %v8114_v27 = vpop.f32.mrb[42].mxu1 }
 0x95d   : > { %v6772_v11 = vpop.f32.mrb[43].mxu1 }
 0x960   : > { %v8116_v13 = vpop.f32.mrb[44].mxu1 }
 0x961   : > { %v8118_v23 = vpop.f32.mrb[50].mxu0  ;;  %v6782_v24 = vpop.f32.mrb[45].mxu1 }
 0x962   : > { %v6777_v26 = vpop.f32.mrb[51].mxu0 }
 0x965   : > { %v8120_v29 = vpop.f32.mrb[52].mxu0 }
 0x966   : > { %v6787_v62 = vpop.f32.mrb[53].mxu0 }
 0x995   : > { %v8122_v53 = vpop.f32.mrb[46].mxu1 }
 0x996   : > { %v6792_v5 = vpop.f32.mrb[47].mxu1 }
 0x999   : > { %v4383_v7 = vpop.f32.mrb[48].mxu1 }
 0x99a   : > { %v8124_v35 = vpop.f32.mrb[54].mxu0  ;;  %v4933_v12 = vmul.f32 0.35355338, %v4383_v7  ;;  %v6802_v51 = vpop.f32.mrb[49].mxu1 }
 0x99b   : > { %v6797_v28 = vpop.f32.mrb[55].mxu0 }
 0x99c   : > { %v4941_v54 = vsel %vm335_vm2, %v4933_v12, -inf }
 0x99d   : > { %4942 = vmax.xlane.f32.xlu0 %v4941_v54  ;;  %v4539_v33 = vpop.f32.mrb[50].mxu1 }
 0x99e   : > { %v4461_v31 = vpop.f32.mrb[56].mxu0  ;;  %v4935_v56 = vmul.f32 0.35355338, %v4539_v33  ;;  %v6812_v39 = vpop.f32.mrb[51].mxu1 }
 0x99f   : > { %v4934_v58 = vmul.f32 0.35355338, %v4461_v31  ;;  %v6807_v48 = vpop.f32.mrb[57].mxu0 }
 0x9a0   : > { %v4947_v10 = vsel %vm335_vm2, %v4935_v56, -inf }
 0x9a1   : > { %4948 = vmax.xlane.f32.xlu0 %v4947_v10  ;;  %v4695_v50 = vpop.f32.mrb[52].mxu1  ;;  %v4944_v0 = vsel %vm335_vm2, %v4934_v58, -inf }
 0x9a2   : > { %v4937_v1 = vmul.f32 0.35355338, %v4695_v50  ;;  %4945 = vmax.xlane.f32.xlu1 %v4944_v0  ;;  %v4617_v37 = vpop.f32.mrb[58].mxu0  ;;  %v6822_v2 = vpop.f32.mrb[53].mxu1 }
 0x9a3   : > { %v4936_v49 = vmul.f32 0.35355338, %v4617_v37  ;;  %v6817_v3 = vpop.f32.mrb[59].mxu0 }
 0x9a4   : > { %v4953_v60 = vsel %vm335_vm2, %v4937_v1, -inf }
 0x9a5   : > { %v4851_v61 = vpop.f32.mrb[54].mxu1  ;;  %v4950_v42 = vsel %vm335_vm2, %v4936_v49, -inf }
 0x9a6   : > { %v4939_v46 = vmul.f32 0.35355338, %v4851_v61  ;;  %4954 = vmax.xlane.f32.xlu1 %v4953_v60  ;;  %4951 = vmax.xlane.f32.xlu0 %v4950_v42  ;;  %v4773_v4 = vpop.f32.mrb[60].mxu0  ;;  %v6832_v8 = vpop.f32.mrb[55].mxu1 }
 0x9a7   : > { %v4938_v25 = vmul.f32 0.35355338, %v4773_v4  ;;  %v6827_v11 = vpop.f32.mrb[61].mxu0 }
 0x9a8   : > { %v4959_v24 = vsel %vm335_vm2, %v4939_v46, -inf }
 0x9a9   : > { %v4956_v26 = vsel %vm335_vm2, %v4938_v25, -inf }
 0x9aa   : > { %4960 = vmax.xlane.f32.xlu1 %v4959_v24  ;;  %4957 = vmax.xlane.f32.xlu0 %v4956_v26  ;;  %v4929_v62 = vpop.f32.mrb[62].mxu0 }
 0x9ab   : > { %v4940_v5 = vmul.f32 0.35355338, %v4929_v62  ;;  %v6837_v7 = vpop.f32.mrb[63].mxu0 }
 0x9ad   : > { %v4962_v51 = vsel %vm335_vm2, %v4940_v5, -inf }
 0x9ae   : > { %4963 = vmax.xlane.f32.xlu0 %v4962_v51 }
 0x9bb   : > { %5029 = vrot.lane.b32.xlu1 %v7432_v16, %s7267_s6 }
 0x9bf   : > { %5181 = vrot.lane.b32.xlu1 %v7437_v18, %s7267_s6 }
 0x9c3   : > { %5257 = vrot.lane.b32.xlu1 %v7435_v17, %s7267_s6 }
 0x9c4   : > { %5105 = vrot.lane.b32.xlu0 %v7429_v15, %s7267_s6 }
 0x9c7   : > { %5409 = vrot.lane.b32.xlu1 %v7441_v19, %s7267_s6 }
 0x9c8   : > { %5333 = vrot.lane.b32.xlu0 %v7444_v20, %s7267_s6 }
 0xa2a   : > { %v4943_v28 = vpop.xlane.xlu0 %4942 }
 0xa2b   : > { %v4965_v54 = vsub.f32 %v4933_v12, %v4943_v28 }
 0xa2d   : > { %v4973_v33 = vmul.f32 1.442695, %v4965_v54 }
 0xa2e   : > { %v4949_v31 = vpop.xlane.xlu0 %4948 }
 0xa2f   : > { %7074 = vpow2.f32 %v4973_v33  ;;  %v4967_v16 = vsub.f32 %v4935_v56, %v4949_v31  ;;  %v4946_v39 = vpop.xlane.xlu1 %4945 }
 0xa30   : > { %v4966_v18 = vsub.f32 %v4934_v58, %v4946_v39 }
 0xa31   : > { %v4977_v48 = vmul.f32 1.442695, %v4967_v16 }
 0xa32   : > { %v4975_v10 = vmul.f32 1.442695, %v4966_v18 }
 0xa33   : > { %7076 = vpow2.f32 %v4977_v48  ;;  %v4955_v17 = vpop.xlane.xlu1 %4954  ;;  %v4952_v50 = vpop.xlane.xlu0 %4951 }
 0xa34   : > { %7078 = vpow2.f32 %v4975_v10  ;;  %v4969_v15 = vsub.f32 %v4937_v1, %v4955_v17  ;;  %v4968_v0 = vsub.f32 %v4936_v49, %v4952_v50 }
 0xa36   : > { %v4981_v19 = vmul.f32 1.442695, %v4969_v15  ;;  %v4979_v37 = vmul.f32 1.442695, %v4968_v0 }
 0xa37   : > { %v4961_v2 = vpop.xlane.xlu1 %4960  ;;  %v4958_v20 = vpop.xlane.xlu0 %4957 }
 0xa38   : > { %7080 = vpow2.f32 %v4981_v19  ;;  %v4971_v12 = vsub.f32 %v4939_v46, %v4961_v2  ;;  %v4970_v3 = vsub.f32 %v4938_v25, %v4958_v20 }
 0xa39   : > { %v8146_v60 = vpop.eup %7074  ;;  %7082 = vpow2.f32 %v4979_v37 }
 0xa3a   : > { %v4985_v56 = vmul.f32 1.442695, %v4971_v12  ;;  %v4983_v58 = vmul.f32 1.442695, %v4970_v3  ;;  %v4989_v61 = vsel %vm335_vm2, %v8146_v60, 0.0  ;;  %v5759_v12 = vld [vmem:[%s8429_s2] sm:$0xff] }
 0xa3b   : > { %v5030_v42 = vpop.permute.xlu1 %5029  ;;  %v4964_v4 = vpop.xlane.xlu0 %4963  ;;  %4990 = vadd.xlane.f32.xlu1 %v4989_v61  ;;  %v5760_v3 = vld [vmem:[%s8429_s2 + $0x8] sm:$0xff] }
 0xa3c   : > { %7084 = vpow2.f32 %v4985_v56  ;;  %v4972_v1 = vsub.f32 %v4940_v5, %v4964_v4  ;;  %6839 = vmatpush3.msra.mxu1 %v5030_v42  ;;  %v5761_v56 = vld [vmem:[%s8429_s2 + $0x10] sm:$0xff] }
 0xa3d   : > { %v8150_v49 = vpop.eup %7076  ;;  %7086 = vpow2.f32 %v4983_v58  ;;  %6848 = vmatprep.subr.mxu1 %v7255_v14 }
 0xa3e   : > { %v8153_v46 = vpop.eup %7078  ;;  %v4987_v8 = vmul.f32 1.442695, %v4972_v1  ;;  %v4995_v25 = vsel %vm335_vm2, %v8150_v49, 0.0 }
 0xa3f   : > { %v5106_v11 = vpop.permute.xlu0 %5105  ;;  %4996 = vadd.xlane.f32.xlu1 %v4995_v25  ;;  %v4992_v24 = vsel %vm335_vm2, %v8153_v46, 0.0 }
 0xa40   : > { %7088 = vpow2.f32 %v4987_v8  ;;  %4993 = vadd.xlane.f32.xlu0 %v4992_v24  ;;  %6844 = vmatpush3.msra.mxu0 %v5106_v11 }
 0xa41   : > { %6853 = vmatprep.subr.mxu0 %v7255_v14 }
 0xa42   : > { %v8160_v26 = vpop.eup %7080 }
 0xa43   : > { %v8162_v62 = vpop.eup %7082  ;;  %v5001_v5 = vsel %vm335_vm2, %v8160_v26, 0.0 }
 0xa44   : > { %5002 = vadd.xlane.f32.xlu1 %v5001_v5  ;;  %v4998_v7 = vsel %vm335_vm2, %v8162_v62, 0.0 }
 0xa45   : > { %4999 = vadd.xlane.f32.xlu0 %v4998_v7 }
 0xa46   : > { %v8168_v51 = vpop.eup %7084 }
 0xa47   : > { %v8170_v28 = vpop.eup %7086  ;;  %v5007_v54 = vsel %vm335_vm2, %v8168_v51, 0.0 }
 0xa48   : > { %5008 = vadd.xlane.f32.xlu1 %v5007_v54  ;;  %v5004_v33 = vsel %vm335_vm2, %v8170_v28, 0.0 }
 0xa49   : > { %5005 = vadd.xlane.f32.xlu0 %v5004_v33 }
 0xa4a   : > { %v8176_v31 = vpop.eup %7088 }
 0xa4b   : > { %v5010_v16 = vsel %vm335_vm2, %v8176_v31, 0.0 }
 0xa4d   : > { %5011 = vadd.xlane.f32.xlu0 %v5010_v16 }
 0xa59   : > { %5561 = vrot.lane.b32.xlu1 %v7447_v21, %s7267_s6  ;;  %v5182_v21 = vpop.permute.xlu1 %5181 }
 0xa5d   : > { %5647 = vrot.lane.b32.xlu1 %v7916_v30, %s7268_s7 }
 0xa61   : > { %5679 = vrot.lane.b32.xlu1 %v8110_v6, %s7269_s8 }
 0xa63   : > { %5485 = vrot.lane.b32.xlu0 %v7450_v22, %s7267_s6  ;;  %v5258_v22 = vpop.permute.xlu1 %5257  ;;  %s6382_s6 = sshll.u32 %s7313_s16, 7 }
 0xa64   : > { %s8383_s20 = scalar_lea.hbm %s8430_s3, %s6382_s6 }
 0xa65   : > { %5651 = vrot.lane.b32.xlu1 %v7924_v38, %s7268_s7 }
 0xa67   : > { %5645 = vrot.lane.b32.xlu0 %v7918_v32, %s7268_s7  ;;  %v5410_v30 = vpop.permute.xlu1 %5409 }
 0xa69   : > { %5683 = vrot.lane.b32.xlu1 %v8118_v23, %s7269_s8 }
 0xa6b   : > { %5677 = vrot.lane.b32.xlu0 %v8112_v9, %s7269_s8 }
 0xa6d   : > { %5655 = vrot.lane.b32.xlu1 %v7926_v40, %s7268_s7 }
 0xa6f   : > { %5649 = vrot.lane.b32.xlu0 %v7920_v34, %s7268_s7  ;;  %v5334_v34 = vpop.permute.xlu0 %5333 }
 0xa71   : > { %5687 = vrot.lane.b32.xlu1 %v8120_v29, %s7269_s8 }
 0xa73   : > { %5681 = vrot.lane.b32.xlu0 %v8114_v27, %s7269_s8 }
 0xa75   : > { %5659 = vrot.lane.b32.xlu1 %v7928_v44, %s7268_s7 }
 0xa77   : > { %5653 = vrot.lane.b32.xlu0 %v7922_v36, %s7268_s7 }
 0xa79   : > { %5691 = vrot.lane.b32.xlu1 %v8124_v35, %s7269_s8 }
 0xa7b   : > { %5685 = vrot.lane.b32.xlu0 %v8116_v13, %s7269_s8 }
 0xa7f   : > { %5657 = vrot.lane.b32.xlu0 %v7931_v57, %s7268_s7  ;;  %s188_s7 = scalar_lea.vmem [#allocation5], %s6266_s4 }
 0xa83   : > { %5689 = vrot.lane.b32.xlu0 %v8122_v53, %s7269_s8  ;;  %s6188_s8 = sshll.u32 %s188_s7, 4  ;;  %s8385_s8 = int_to_ptr.vmem [resolvable:$true] %s6188_s8 }
 0xa84   : > { %s7184_s16 = scalar_lea.vmem %s8385_s8, 128  ;;  %p7191_p8 = scmp.lt.s32.totalorder %s8385_s8, %s7189_s26 }
 0xa85   : > { %p7185_p6 = scmp.ne.s32.totalorder %s8385_s8, %s7184_s16  ;;  %p7192_p9 = scmp.lt.s32.totalorder %s7190_s27, %s7184_s16 }
 0xa87   : > { %p7186_p11 = pnand %p7185_p6, %p8437_p10  ;;  %p7193_p13 = por %p7192_p9, %p7191_p8 }
 0xa89   : > { %p7187_p12 = pneg %p7186_p11 }
 0xa8b   : > { %p7194_p1 = pnand %p7193_p13, %p7187_p12 }
 0xac8   : > { %v4991_v32 = vpop.xlane.xlu1 %4990 }
 0xac9   : > { %7090 = vrcp.f32 %v4991_v32 }
 0xacc   : > { %v4997_v38 = vpop.xlane.xlu1 %4996 }
 0xacd   : > { %7092 = vrcp.f32 %v4997_v38  ;;  %v4994_v40 = vpop.xlane.xlu0 %4993 }
 0xace   : > { %7094 = vrcp.f32 %v4994_v40 }
 0xad1   : > { %v5003_v44 = vpop.xlane.xlu1 %5002 }
 0xad2   : > { %7096 = vrcp.f32 %v5003_v44  ;;  %v5000_v36 = vpop.xlane.xlu0 %4999 }
 0xad3   : > { %v7091_v6 = vpop.eup %7090  ;;  %7098 = vrcp.f32 %v5000_v36 }
 0xad4   : > { %v5021_v9 = vmul.f32 %v7091_v6, %v8146_v60  ;;  %v6906_v60 = vpack.c.bf16 %v5760_v3, %v5759_v12 }
 0xad5   : > { %v5009_v57 = vpop.xlane.xlu1 %5008 }
 0xad6   : > { %7100 = vrcp.f32 %v5009_v57  ;;  %v5006_v27 = vpop.xlane.xlu0 %5005  ;;  %6841 = vmatmul.mubr.msk.f32.vlgmr.msra.gmra.mrb[56].mxu1 %vm335_vm2, %v5021_v9 }
 0xad7   : > { %v7093_v13 = vpop.eup %7092  ;;  %7102 = vrcp.f32 %v5006_v27  ;;  %6849 = vmatpush3.msra.mxu1 %v5182_v21  ;;  %6850 = vmatprep.mubr.msk.f32.mxu1 %vm7256_vm1, %v7255_v14 }
 0xad8   : > { %v7095_v23 = vpop.eup %7094  ;;  %v5023_v29 = vmul.f32 %v7093_v13, %v8150_v49  ;;  %6858 = vmatprep.subr.mxu1 %v7255_v14 }
 0xad9   : > { %v5022_v53 = vmul.f32 %v7095_v23, %v8153_v46  ;;  %v5562_v37 = vpop.permute.xlu1 %5561 }
 0xada   : > { %v5012_v35 = vpop.xlane.xlu0 %5011  ;;  %6851 = vmatmul.mubr.msk.f32.vlgmr.msra.gmra.mrb[58].mxu1 %vm335_vm2, %v5023_v29 }
 0xadb   : > { %7104 = vrcp.f32 %v5012_v35  ;;  %6846 = vmatmul.mubr.msk.f32.vlgmr.msra.gmra.mrb[64].mxu0 %vm335_vm2, %v5022_v53  ;;  %6859 = vmatpush3.msra.mxu1 %v5334_v34 }
 0xadc   : > { %v7097_v39 = vpop.eup %7096  ;;  %6854 = vmatpush3.msra.mxu0 %v5258_v22  ;;  %6855 = vmatprep.mubr.msk.f32.mxu0 %vm7256_vm1, %v7255_v14 }
 0xadd   : > { %v7099_v18 = vpop.eup %7098  ;;  %v5025_v48 = vmul.f32 %v7097_v39, %v8160_v26  ;;  %6860 = vmatprep.mubr.msk.f32.mxu1 %vm7256_vm1, %v7255_v14  ;;  %6863 = vmatprep.subr.mxu0 %v7255_v14  ;;  %v5648_v33 = vpop.permute.xlu1 %5647 }
 0xade   : > { %v5024_v10 = vmul.f32 %v7099_v18, %v8162_v62  ;;  %v5486_v17 = vpop.permute.xlu0 %5485  ;;  %6868 = vmatprep.subr.mxu1 %v7255_v14  ;;  %v5734_v35 = vsel %vm335_vm2, %v7695_v41, %v5648_v33 }
 0xadf   : > { %6861 = vmatmul.mubr.msk.f32.vlgmr.msra.gmra.mrb[60].mxu1 %vm335_vm2, %v5025_v48 }
 0xae0   : > { %v7101_v50 = vpop.eup %7100  ;;  %6856 = vmatmul.mubr.msk.f32.vlgmr.msra.gmra.mrb[66].mxu0 %vm335_vm2, %v5024_v10  ;;  %6869 = vmatpush3.msra.mxu1 %v5486_v17 }
 0xae1   : > { %v7103_v15 = vpop.eup %7102  ;;  %v5027_v0 = vmul.f32 %v7101_v50, %v8168_v51  ;;  %6864 = vmatpush3.msra.mxu0 %v5410_v30  ;;  %6865 = vmatprep.mubr.msk.f32.mxu0 %vm7256_vm1, %v7255_v14  ;;  %v5680_v16 = vpop.permute.xlu1 %5679 }
 0xae2   : > { %v5026_v19 = vmul.f32 %v7103_v15, %v8170_v28  ;;  %6870 = vmatprep.mubr.msk.f32.mxu1 %vm7256_vm1, %v7255_v14  ;;  %6873 = vmatprep.subr.mxu0 %v7255_v14  ;;  %v5646_v54 = vpop.permute.xlu0 %5645 }
 0xae3   : > { %6871 = vmatmul.mubr.msk.f32.vlgmr.msra.gmra.mrb[62].mxu1 %vm335_vm2, %v5027_v0  ;;  %6907 = vmatprep.subr.bf16.mxu1 %v6906_v60  ;;  %v5733_v57 = vsel %vm335_vm2, %v7703_v52, %v5646_v54  ;;  %v5743_v52 = vsel %vm5741_vm4, %v5734_v35, %v5680_v16 }
 0xae4   : > { %6866 = vmatmul.mubr.msk.f32.vlgmr.msra.gmra.mrb[68].mxu0 %vm335_vm2, %v5026_v19  ;;  %6909 = vmatpush3.bf16.msra.mxu1 %v6906_v60 }
 0xae5   : > { %v7105_v2 = vpop.eup %7104  ;;  %6874 = vmatpush3.msra.mxu0 %v5562_v37  ;;  %6875 = vmatprep.mubr.msk.f32.mxu0 %vm7256_vm1, %v7255_v14  ;;  %v5762_v14 = vld [vmem:[%s8429_s2 + $0x18] sm:$0xff]  ;;  %v5652_v22 = vpop.permute.xlu1 %5651 }
 0xae6   : > { %v5028_v20 = vmul.f32 %v7105_v2, %v8176_v31  ;;  %v6910_v58 = vpack.c.bf16 %v5762_v14, %v5761_v56  ;;  %v5678_v31 = vpop.permute.xlu0 %5677  ;;  %v5736_v41 = vsel %vm335_vm2, %v7697_v43, %v5652_v22 }
 0xae7   : > { %v5742_v27 = vsel %vm5741_vm4, %v5733_v57, %v5678_v31 }
 0xae8   : > { %6876 = vmatmul.mubr.msk.f32.vlgmr.msra.gmra.mrb[70].mxu0 %vm335_vm2, %v5028_v20  ;;  %6911 = vmatprep.subr.bf16.mxu1 %v6910_v58 }
 0xae9   : > { %6913 = vmatpush3.bf16.msra.mxu1 %v6910_v58  ;;  %v5684_v32 = vpop.permute.xlu1 %5683 }
 0xaea   : > { %v5650_v21 = vpop.permute.xlu0 %5649  ;;  %v5745_v0 = vsel %vm5741_vm4, %v5736_v41, %v5684_v32 }
 0xaeb   : > { %v5735_v53 = vsel %vm335_vm2, %v7706_v55, %v5650_v21 }
 0xaed   : > { %v5656_v38 = vpop.permute.xlu1 %5655 }
 0xaee   : > { %v5682_v30 = vpop.permute.xlu0 %5681  ;;  %v5738_v43 = vsel %vm335_vm2, %v7699_v45, %v5656_v38 }
 0xaef   : > { %v5744_v39 = vsel %vm5741_vm4, %v5735_v53, %v5682_v30 }
 0xaf1   : > { %v5688_v44 = vpop.permute.xlu1 %5687 }
 0xaf2   : > { %v5654_v34 = vpop.permute.xlu0 %5653  ;;  %v5747_v3 = vsel %vm5741_vm4, %v5738_v43, %v5688_v44 }
 0xaf3   : > { %v5737_v55 = vsel %vm335_vm2, %v7708_v59, %v5654_v34 }
 0xaf5   : > { %v5660_v6 = vpop.permute.xlu1 %5659 }
 0xaf6   : > { %v5686_v40 = vpop.permute.xlu0 %5685  ;;  %v5740_v45 = vsel %vm335_vm2, %v7701_v47, %v5660_v6 }
 0xaf7   : > { %v5746_v50 = vsel %vm5741_vm4, %v5737_v55, %v5686_v40 }
 0xaf9   : > { %v5692_v23 = vpop.permute.xlu1 %5691 }
 0xafa   : > { %v5658_v36 = vpop.permute.xlu0 %5657  ;;  %v5749_v14 = vsel %vm5741_vm4, %v5740_v45, %v5692_v23 }
 0xafb   : > { %v5739_v59 = vsel %vm335_vm2, %v7710_v63, %v5658_v36 }
 0xafe   : > { %v5690_v9 = vpop.permute.xlu0 %5689 }
 0xaff   : > { %v5748_v20 = vsel %vm5741_vm4, %v5739_v59, %v5690_v9 }
 0xba9   : > { %v5101_v61 = vpop.f32.mrb[56].mxu1 }
 0xbaa   : > { %v6842_v42 = vpop.f32.mrb[57].mxu1  ;;  %5709 = vrot.lane.b32.xlu0 %v5101_v61, %s7270_s29 }
 0xbab   : > { %v6371_v42 = vld [vmem:[%s8429_s2 + $0x20] ss:$0 sm:$0xff] }
 0xbad   : > { %v5253_v4 = vpop.f32.mrb[58].mxu1 }
 0xbae   : > { %v5177_v1 = vpop.f32.mrb[64].mxu0  ;;  %v6852_v49 = vpop.f32.mrb[59].mxu1  ;;  %5713 = vrot.lane.b32.xlu0 %v5253_v4, %s7270_s29 }
 0xbaf   : > { %5711 = vrot.lane.b32.xlu1 %v5177_v1, %s7270_s29  ;;  %v6847_v46 = vpop.f32.mrb[65].mxu0 }
 0xbb2   : > { %v5405_v8 = vpop.f32.mrb[60].mxu1 }
 0xbb3   : > { %v5329_v25 = vpop.f32.mrb[66].mxu0  ;;  %5717 = vrot.lane.b32.xlu0 %v5405_v8, %s7270_s29  ;;  %v6862_v11 = vpop.f32.mrb[61].mxu1 }
 0xbb4   : > { %5715 = vrot.lane.b32.xlu1 %v5329_v25, %s7270_s29  ;;  %v6857_v24 = vpop.f32.mrb[67].mxu0 }
 0xbb6   : > { %v5557_v26 = vpop.f32.mrb[62].mxu1 }
 0xbb7   : > { %v5481_v62 = vpop.f32.mrb[68].mxu0  ;;  %5721 = vrot.lane.b32.xlu0 %v5557_v26, %s7270_s29  ;;  %v6872_v5 = vpop.f32.mrb[63].mxu1 }
 0xbb8   : > { %5719 = vrot.lane.b32.xlu1 %v5481_v62, %s7270_s29  ;;  %v6867_v7 = vpop.f32.mrb[69].mxu0 }
 0xbb9   : > { %v6380_v7 = vld [vmem:[%s8429_s2 + $0x21] ss:$0 sm:$0xff] }
 0xbbb   : > { %v5633_v51 = vpop.f32.mrb[70].mxu0 }
 0xbbc   : > { %5723 = vrot.lane.b32.xlu1 %v5633_v51, %s7270_s29  ;;  %v6877_v28 = vpop.f32.mrb[71].mxu0 }
 0xc1c   : > { %v5710_v13 = vpop.permute.xlu0 %5709 }
 0xc1d   : > { %v8248_v29 = vsel %vm5750_vm3, %v5742_v27, %v5710_v13 }
 0xc1e   : > { %6886 = vmatprep.mubr.msk.f32.mxu1 %vm202_vm0, %v8248_v29 }
 0xc20   : > { %v5714_v18 = vpop.permute.xlu0 %5713 }
 0xc21   : > { %v8259_v48 = vsel %vm5750_vm3, %v5744_v39, %v5714_v18  ;;  %v5712_v10 = vpop.permute.xlu1 %5711 }
 0xc22   : > { %v8262_v17 = vsel %vm5750_vm3, %v5743_v52, %v5712_v10 }
 0xc23   : > { %6887 = vmatmul.mubr.msk.f32.vlgmr.msra.gmra.mrb[64].mxu1 %vm202_vm0, %v8262_v17 }
 0xc24   : > { %6889 = vmatprep.mubr.msk.f32.mxu1 %vm202_vm0, %v8259_v48 }
 0xc25   : > { %v5718_v15 = vpop.permute.xlu0 %5717 }
 0xc26   : > { %v8275_v19 = vsel %vm5750_vm3, %v5746_v50, %v5718_v15  ;;  %v5716_v37 = vpop.permute.xlu1 %5715 }
 0xc27   : > { %v8278_v2 = vsel %vm5750_vm3, %v5745_v0, %v5716_v37 }
 0xc28   : > { %6890 = vmatmul.mubr.msk.f32.gmra.mrb[66].mxu1 %vm202_vm0, %v8278_v2 }
 0xc29   : > { %6892 = vmatprep.mubr.msk.f32.mxu1 %vm202_vm0, %v8275_v19  ;;  %v5722_v12 = vpop.permute.xlu0 %5721 }
 0xc2a   : > { %v8291_v60 = vsel %vm5750_vm3, %v5748_v20, %v5722_v12  ;;  %v5720_v56 = vpop.permute.xlu1 %5719 }
 0xc2b   : > { %v8294_v63 = vsel %vm5750_vm3, %v5747_v3, %v5720_v56 }
 0xc2c   : > { %6893 = vmatmul.mubr.msk.f32.gmra.mrb[68].mxu1 %vm202_vm0, %v8294_v63 }
 0xc2d   : > { %6895 = vmatprep.mubr.msk.f32.mxu1 %vm202_vm0, %v8291_v60 }
 0xc2e   : > { %v5724_v58 = vpop.permute.xlu1 %5723 }
 0xc2f   : > { %v8304_v61 = vsel %vm5750_vm3, %v5749_v14, %v5724_v58 }
 0xc30   : > { %6896 = vmatmul.mubr.msk.f32.gmra.mrb[70].mxu1 %vm202_vm0, %v8304_v61 }
 0xcf6   : > { %v6888_v4 = vpop.f32.mrb[64].mxu1 }
 0xcf7   : > { %v5865_v1 = vadd.f32 %v6888_v4, %v6371_v42  ;;  %v5859_v49 = vpop.f32.mrb[65].mxu1 }
 0xcf8   : > { %v5860_v47 = vadd.f32 %v6371_v42, %v5859_v49 }
 0xcf9   : > { %7106 = vtanh.f32 %v5865_v1 }
 0xcfa   : > { %7108 = vtanh.f32 %v5860_v47 }
 0xcfb   : > { %v6891_v46 = vpop.f32.mrb[66].mxu1 }
 0xcfc   : > { %v5875_v8 = vadd.f32 %v6891_v46, %v6371_v42  ;;  %v5869_v25 = vpop.f32.mrb[67].mxu1 }
 0xcfd   : > { %v5870_v11 = vadd.f32 %v6371_v42, %v5869_v25 }
 0xcfe   : > { %7110 = vtanh.f32 %v5875_v8 }
 0xcff   : > { %7112 = vtanh.f32 %v5870_v11  ;;  %v6894_v24 = vpop.f32.mrb[68].mxu1 }
 0xd00   : > { %v5885_v26 = vadd.f32 %v6894_v24, %v6371_v42  ;;  %v5879_v62 = vpop.f32.mrb[69].mxu1 }
 0xd01   : > { %v5880_v5 = vadd.f32 %v6371_v42, %v5879_v62 }
 0xd02   : > { %7114 = vtanh.f32 %v5885_v26 }
 0xd03   : > { %v7107_v51 = vpop.eup %7106  ;;  %7116 = vtanh.f32 %v5880_v5  ;;  %v6897_v28 = vpop.f32.mrb[70].mxu1 }
 0xd04   : > { %v7109_v54 = vpop.eup %7108  ;;  %v5895_v33 = vadd.f32 %v6897_v28, %v6371_v42  ;;  %v5889_v31 = vpop.f32.mrb[71].mxu1  ;;  %v5911_v16 = vmul.f32 %v7107_v51, %v6380_v7 }
 0xd05   : > { %v5890_v21 = vadd.f32 %v6371_v42, %v5889_v31  ;;  %v5910_v22 = vmul.f32 %v7109_v54, %v6380_v7 }
 0xd06   : > { %7118 = vtanh.f32 %v5895_v33  ;;  %v5921_v30 = vsel %vm5741_vm4, %v5911_v16, 0.0 }
 0xd07   : > { %7120 = vtanh.f32 %v5890_v21  ;;  %5922 = vadd.xlane.f32.xlu1 %v5921_v30  ;;  %v5918_v32 = vsel %vm5741_vm4, %v5910_v22, 0.0 }
 0xd08   : > { %v7111_v34 = vpop.eup %7110  ;;  %5919 = vadd.xlane.f32.xlu0 %v5918_v32 }
 0xd09   : > { %v7113_v38 = vpop.eup %7112  ;;  %v5913_v40 = vmul.f32 %v7111_v34, %v6380_v7 }
 0xd0a   : > { %v5912_v36 = vmul.f32 %v7113_v38, %v6380_v7 }
 0xd0b   : > { %v5927_v44 = vsel %vm5741_vm4, %v5913_v40, 0.0 }
 0xd0c   : > { %v7115_v6 = vpop.eup %7114  ;;  %5928 = vadd.xlane.f32.xlu0 %v5927_v44  ;;  %v5924_v27 = vsel %vm5741_vm4, %v5912_v36, 0.0 }
 0xd0d   : > { %v7117_v9 = vpop.eup %7116  ;;  %v5915_v13 = vmul.f32 %v7115_v6, %v6380_v7 }
 0xd0e   : > { %v5914_v57 = vmul.f32 %v7117_v9, %v6380_v7 }
 0xd0f   : > { %v5933_v18 = vsel %vm5741_vm4, %v5915_v13, 0.0 }
 0xd10   : > { %v7119_v23 = vpop.eup %7118  ;;  %5925 = vadd.xlane.f32.xlu0 %v5924_v27  ;;  %v5930_v53 = vsel %vm5741_vm4, %v5914_v57, 0.0 }
 0xd11   : > { %v7121_v35 = vpop.eup %7120  ;;  %5931 = vadd.xlane.f32.xlu1 %v5930_v53  ;;  %v5917_v52 = vmul.f32 %v7119_v23, %v6380_v7 }
 0xd12   : > { %v5916_v39 = vmul.f32 %v7121_v35, %v6380_v7 }
 0xd13   : > { %v5939_v55 = vsel %vm5741_vm4, %v5917_v52, 0.0 }
 0xd14   : > { %5934 = vadd.xlane.f32.xlu0 %v5933_v18  ;;  %v5936_v10 = vsel %vm5741_vm4, %v5916_v39, 0.0 }
 0xd15   : > { %5937 = vadd.xlane.f32.xlu1 %v5936_v10 }
 0xd18   : > { %5940 = vadd.xlane.f32.xlu0 %v5939_v55 }
 0xd94   : > { %v5923_v41 = vpop.xlane.xlu1 %5922 }
 0xd95   : > { %v5948_v50 = vrot.slane %v5923_v41, 4  ;;  %v5920_v15 = vpop.xlane.xlu0 %5919 }
 0xd96   : > { %v5942_v0 = vrot.slane %v5920_v15, 4 }
 0xd97   : > { %v5949_v37 = vmax.f32 %v5923_v41, %v5948_v50 }
 0xd98   : > { %v5943_v59 = vmax.f32 %v5920_v15, %v5942_v0 }
 0xd99   : > { %v5950_v43 = vrot.slane %v5949_v37, 2  ;;  %v5929_v20 = vpop.xlane.xlu0 %5928 }
 0xd9a   : > { %v5944_v12 = vrot.slane %v5943_v59, 2  ;;  %v5960_v3 = vrot.slane %v5929_v20, 4 }
 0xd9b   : > { %v5951_v56 = vmax.f32 %v5949_v37, %v5950_v43 }
 0xd9c   : > { %v5945_v45 = vmax.f32 %v5943_v59, %v5944_v12  ;;  %v5961_v14 = vmax.f32 %v5929_v20, %v5960_v3 }
 0xd9d   : > { %v5952_v58 = vrot.slane %v5951_v56, 1  ;;  %v5926_v42 = vpop.xlane.xlu0 %5925 }
 0xd9e   : > { %v5946_v4 = vrot.slane %v5945_v45, 1  ;;  %v5962_v1 = vrot.slane %v5961_v14, 2  ;;  %v5954_v49 = vrot.slane %v5926_v42, 4  ;;  %v5932_v47 = vpop.xlane.xlu1 %5931 }
 0xd9f   : > { %v5953_v46 = vmax.f32 %v5951_v56, %v5952_v58  ;;  %v5966_v8 = vrot.slane %v5932_v47, 4 }
 0xda0   : > { %v5947_v25 = vmax.f32 %v5945_v45, %v5946_v4  ;;  %v5963_v11 = vmax.f32 %v5961_v14, %v5962_v1  ;;  %v5955_v24 = vmax.f32 %v5926_v42, %v5954_v49 }
 0xda1   : > { %v5991_v26 = vsub.f32 %v5923_v41, %v5953_v46  ;;  %v5967_v62 = vmax.f32 %v5932_v47, %v5966_v8  ;;  %v5935_v5 = vpop.xlane.xlu0 %5934 }
 0xda2   : > { %v5990_v7 = vsub.f32 %v5920_v15, %v5947_v25  ;;  %v5964_v51 = vrot.slane %v5963_v11, 1  ;;  %v5956_v28 = vrot.slane %v5955_v24, 2  ;;  %v5972_v54 = vrot.slane %v5935_v5, 4  ;;  %v5938_v33 = vpop.xlane.xlu1 %5937 }
 0xda3   : > { %v6000_v31 = vmul.f32 1.442695, %v5991_v26  ;;  %v5968_v16 = vrot.slane %v5967_v62, 2  ;;  %v5978_v21 = vrot.slane %v5938_v33, 4 }
 0xda4   : > { %v5998_v22 = vmul.f32 1.442695, %v5990_v7  ;;  %v5965_v30 = vmax.f32 %v5963_v11, %v5964_v51  ;;  %v5957_v32 = vmax.f32 %v5955_v24, %v5956_v28  ;;  %v5973_v34 = vmax.f32 %v5935_v5, %v5972_v54 }
 0xda5   : > { %7122 = vpow2.f32 %v6000_v31  ;;  %v5969_v38 = vmax.f32 %v5967_v62, %v5968_v16  ;;  %v5979_v40 = vmax.f32 %v5938_v33, %v5978_v21  ;;  %v5941_v44 = vpop.xlane.xlu0 %5940 }
 0xda6   : > { %7124 = vpow2.f32 %v5998_v22  ;;  %v5993_v36 = vsub.f32 %v5929_v20, %v5965_v30  ;;  %v5958_v6 = vrot.slane %v5957_v32, 1  ;;  %v5974_v9 = vrot.slane %v5973_v34, 2 }
 0xda7   : > { %v5970_v57 = vrot.slane %v5969_v38, 1  ;;  %v5980_v27 = vrot.slane %v5979_v40, 2  ;;  %v5984_v13 = vrot.slane %v5941_v44, 4 }
 0xda8   : > { %v6004_v23 = vmul.f32 1.442695, %v5993_v36  ;;  %v5959_v53 = vmax.f32 %v5957_v32, %v5958_v6  ;;  %v5975_v35 = vmax.f32 %v5973_v34, %v5974_v9 }
 0xda9   : > { %v5971_v39 = vmax.f32 %v5969_v38, %v5970_v57  ;;  %v5981_v18 = vmax.f32 %v5979_v40, %v5980_v27  ;;  %v5985_v52 = vmax.f32 %v5941_v44, %v5984_v13 }
 0xdaa   : > { %7126 = vpow2.f32 %v6004_v23  ;;  %v5992_v10 = vsub.f32 %v5926_v42, %v5959_v53  ;;  %v5976_v55 = vrot.slane %v5975_v35, 1 }
 0xdab   : > { %v5994_v41 = vsub.f32 %v5932_v47, %v5971_v39  ;;  %v5982_v50 = vrot.slane %v5981_v18, 1  ;;  %v5986_v15 = vrot.slane %v5985_v52, 2 }
 0xdac   : > { %v6002_v0 = vmul.f32 1.442695, %v5992_v10  ;;  %v5977_v37 = vmax.f32 %v5975_v35, %v5976_v55 }
 0xdad   : > { %v6006_v59 = vmul.f32 1.442695, %v5994_v41  ;;  %v5983_v43 = vmax.f32 %v5981_v18, %v5982_v50  ;;  %v5987_v20 = vmax.f32 %v5985_v52, %v5986_v15 }
 0xdae   : > { %7128 = vpow2.f32 %v6002_v0  ;;  %v5995_v12 = vsub.f32 %v5935_v5, %v5977_v37 }
 0xdaf   : > { %v8322_v3 = vpop.eup %7122  ;;  %7130 = vpow2.f32 %v6006_v59  ;;  %v5996_v56 = vsub.f32 %v5938_v33, %v5983_v43  ;;  %v5988_v45 = vrot.slane %v5987_v20, 1 }
 0xdb0   : > { %v8324_v14 = vpop.eup %7124  ;;  %v6020_v58 = vrot.slane %v8322_v3, 4  ;;  %v6008_v42 = vmul.f32 1.442695, %v5995_v12 }
 0xdb1   : > { %v6014_v4 = vrot.slane %v8324_v14, 4  ;;  %v6010_v1 = vmul.f32 1.442695, %v5996_v56  ;;  %v5989_v49 = vmax.f32 %v5987_v20, %v5988_v45 }
 0xdb2   : > { %v6021_v47 = vadd.f32 %v8322_v3, %v6020_v58  ;;  %7132 = vpow2.f32 %v6008_v42 }
 0xdb3   : > { %v6015_v46 = vadd.f32 %v8324_v14, %v6014_v4  ;;  %7134 = vpow2.f32 %v6010_v1  ;;  %v5997_v8 = vsub.f32 %v5941_v44, %v5989_v49 }
 0xdb4   : > { %v8330_v25 = vpop.eup %7126  ;;  %v6022_v11 = vrot.slane %v6021_v47, 2 }
 0xdb5   : > { %v6016_v24 = vrot.slane %v6015_v46, 2  ;;  %v6032_v26 = vrot.slane %v8330_v25, 4  ;;  %v6012_v62 = vmul.f32 1.442695, %v5997_v8 }
 0xdb6   : > { %v6023_v5 = vadd.f32 %v6022_v11, %v6021_v47 }
 0xdb7   : > { %v6017_v7 = vadd.f32 %v6016_v24, %v6015_v46  ;;  %v6033_v51 = vadd.f32 %v8330_v25, %v6032_v26  ;;  %7136 = vpow2.f32 %v6012_v62 }
 0xdb8   : > { %v8334_v28 = vpop.eup %7128  ;;  %v6024_v54 = vrot.slane %v6023_v5, 1 }
 0xdb9   : > { %v8336_v33 = vpop.eup %7130  ;;  %v6018_v31 = vrot.slane %v6017_v7, 1  ;;  %v6034_v16 = vrot.slane %v6033_v51, 2  ;;  %v6026_v21 = vrot.slane %v8334_v28, 4 }
 0xdba   : > { %v6025_v22 = vadd.f32 %v6024_v54, %v6023_v5  ;;  %v6038_v30 = vrot.slane %v8336_v33, 4 }
 0xdbb   : > { %v6019_v32 = vadd.f32 %v6018_v31, %v6017_v7  ;;  %v6035_v34 = vadd.f32 %v6034_v16, %v6033_v51  ;;  %v6027_v38 = vadd.f32 %v8334_v28, %v6026_v21 }
 0xdbc   : > { %v8341_v40 = vpop.eup %7132  ;;  %v6063_v44 = vadd.f32 1e-08, %v6025_v22  ;;  %v6039_v36 = vadd.f32 %v8336_v33, %v6038_v30 }
 0xdbd   : > { %v8344_v6 = vpop.eup %7134  ;;  %v6062_v9 = vadd.f32 1e-08, %v6019_v32  ;;  %v6036_v57 = vrot.slane %v6035_v34, 1  ;;  %v6028_v27 = vrot.slane %v6027_v38, 2  ;;  %v6044_v13 = vrot.slane %v8341_v40, 4 }
 0xdbe   : > { %7138 = vrcp.f32 %v6063_v44  ;;  %v6040_v23 = vrot.slane %v6039_v36, 2  ;;  %v6050_v53 = vrot.slane %v8344_v6, 4 }
 0xdbf   : > { %7140 = vrcp.f32 %v6062_v9  ;;  %v6037_v35 = vadd.f32 %v6036_v57, %v6035_v34  ;;  %v6029_v39 = vadd.f32 %v6028_v27, %v6027_v38  ;;  %v6045_v18 = vadd.f32 %v8341_v40, %v6044_v13 }
 0xdc0   : > { %v6041_v52 = vadd.f32 %v6040_v23, %v6039_v36  ;;  %v6051_v10 = vadd.f32 %v8344_v6, %v6050_v53 }
 0xdc1   : > { %v8350_v55 = vpop.eup %7136  ;;  %v6065_v41 = vadd.f32 1e-08, %v6037_v35  ;;  %v6030_v50 = vrot.slane %v6029_v39, 1  ;;  %v6046_v15 = vrot.slane %v6045_v18, 2 }
 0xdc2   : > { %v6042_v0 = vrot.slane %v6041_v52, 1  ;;  %v6052_v37 = vrot.slane %v6051_v10, 2  ;;  %v6056_v59 = vrot.slane %v8350_v55, 4 }
 0xdc3   : > { %7142 = vrcp.f32 %v6065_v41  ;;  %v6031_v43 = vadd.f32 %v6030_v50, %v6029_v39  ;;  %v6047_v20 = vadd.f32 %v6046_v15, %v6045_v18 }
 0xdc4   : > { %v6043_v12 = vadd.f32 %v6042_v0, %v6041_v52  ;;  %v6053_v56 = vadd.f32 %v6052_v37, %v6051_v10  ;;  %v6057_v45 = vadd.f32 %v8350_v55, %v6056_v59 }
 0xdc5   : > { %v6064_v58 = vadd.f32 1e-08, %v6031_v43  ;;  %v6048_v42 = vrot.slane %v6047_v20, 1 }
 0xdc6   : > { %v6066_v4 = vadd.f32 1e-08, %v6043_v12  ;;  %v6054_v1 = vrot.slane %v6053_v56, 1  ;;  %v6058_v49 = vrot.slane %v6057_v45, 2 }
 0xdc7   : > { %7144 = vrcp.f32 %v6064_v58  ;;  %v6049_v47 = vadd.f32 %v6048_v42, %v6047_v20 }
 0xdc8   : > { %v7139_v46 = vpop.eup %7138  ;;  %7146 = vrcp.f32 %v6066_v4  ;;  %v6055_v8 = vadd.f32 %v6054_v1, %v6053_v56  ;;  %v6059_v11 = vadd.f32 %v6058_v49, %v6057_v45 }
 0xdc9   : > { %v7141_v24 = vpop.eup %7140  ;;  %v6079_v26 = vmul.f32 %v7139_v46, %v8322_v3  ;;  %v6067_v62 = vadd.f32 1e-08, %v6049_v47 }
 0xdca   : > { %v6078_v5 = vmul.f32 %v7141_v24, %v8324_v14  ;;  %v6068_v7 = vadd.f32 1e-08, %v6055_v8  ;;  %v6060_v51 = vrot.slane %v6059_v11, 1 }
 0xdcb   : > { %v6087_v54 = vmul.f32 %v6079_v26, %v8262_v17  ;;  %7148 = vrcp.f32 %v6067_v62 }
 0xdcc   : > { %v6086_v31 = vmul.f32 %v6078_v5, %v8248_v29  ;;  %7150 = vrcp.f32 %v6068_v7  ;;  %v6061_v16 = vadd.f32 %v6060_v51, %v6059_v11 }
 0xdcd   : > { %v7143_v21 = vpop.eup %7142  ;;  %v6101_v22 = vsel %vm202_vm0, %v6087_v54, 0.0 }
 0xdce   : > { %v6081_v30 = vmul.f32 %v7143_v21, %v8330_v25  ;;  %v6069_v32 = vadd.f32 1e-08, %v6061_v16  ;;  %v6094_v3 = vsel %vm202_vm0, %v6086_v31, 0.0  ;;  %v6102_v34 = vrot.slane %v6101_v22, 4 }
 0xdcf   : > { %v6095_v38 = vrot.slane %v6094_v3, 4 }
 0xdd0   : > { %7152 = vrcp.f32 %v6069_v32  ;;  %v6089_v14 = vmul.f32 %v6081_v30, %v8278_v2  ;;  %v6103_v44 = vadd.f32 %v6102_v34, %v6101_v22 }
 0xdd1   : > { %v7145_v17 = vpop.eup %7144  ;;  %v6096_v36 = vadd.f32 %v6095_v38, %v6094_v3 }
 0xdd2   : > { %v7147_v9 = vpop.eup %7146  ;;  %v6080_v29 = vmul.f32 %v7145_v17, %v8334_v28  ;;  %v6104_v57 = vrot.slane %v6103_v44, 2  ;;  %v6115_v27 = vsel %vm202_vm0, %v6089_v14, 0.0 }
 0xdd3   : > { %v6082_v13 = vmul.f32 %v7147_v9, %v8336_v33  ;;  %v6097_v25 = vrot.slane %v6096_v36, 2  ;;  %v6116_v23 = vrot.slane %v6115_v27, 4 }
 0xdd4   : > { %v6088_v53 = vmul.f32 %v6080_v29, %v8259_v48  ;;  %v6105_v35 = vadd.f32 %v6104_v57, %v6103_v44 }
 0xdd5   : > { %v7149_v39 = vpop.eup %7148  ;;  %v6090_v18 = vmul.f32 %v6082_v13, %v8275_v19  ;;  %v6098_v2 = vadd.f32 %v6097_v25, %v6096_v36  ;;  %v6117_v52 = vadd.f32 %v6116_v23, %v6115_v27 }
 0xdd6   : > { %v7151_v10 = vpop.eup %7150  ;;  %v6083_v41 = vmul.f32 %v7149_v39, %v8341_v40  ;;  %v6108_v28 = vsel %vm202_vm0, %v6088_v53, 0.0  ;;  %v6106_v37 = vrot.slane %v6105_v35, 1 }
 0xdd7   : > { %v6084_v50 = vmul.f32 %v7151_v10, %v8344_v6  ;;  %v6109_v15 = vrot.slane %v6108_v28, 4  ;;  %v6118_v0 = vrot.slane %v6117_v52, 2  ;;  %v6122_v48 = vsel %vm202_vm0, %v6090_v18, 0.0 }
 0xdd8   : > { %v6091_v33 = vmul.f32 %v6083_v41, %v8294_v63  ;;  %v6099_v43 = vrot.slane %v6098_v2, 1  ;;  %v6123_v56 = vrot.slane %v6122_v48, 4  ;;  %v6107_v42 = vadd.f32 %v6106_v37, %v6105_v35 }
 0xdd9   : > { %v6092_v59 = vmul.f32 %v6084_v50, %v8291_v60  ;;  %v6110_v19 = vadd.f32 %v6109_v15, %v6108_v28  ;;  %v6119_v12 = vadd.f32 %v6118_v0, %v6117_v52 }
 0xdda   : > { %v7153_v20 = vpop.eup %7152  ;;  %v6129_v40 = vsel %vm202_vm0, %v6091_v33, 0.0  ;;  %v6124_v4 = vadd.f32 %v6123_v56, %v6122_v48  ;;  %v6100_v49 = vadd.f32 %v6099_v43, %v6098_v2 }
 0xddb   : > { %v6085_v45 = vmul.f32 %v7153_v20, %v8350_v55  ;;  %v6111_v58 = vrot.slane %v6110_v19, 2  ;;  %v6130_v6 = vrot.slane %v6129_v40, 4  ;;  %v6136_v63 = vsel %vm202_vm0, %v6092_v59, 0.0 }
 0xddc   : > { %v6120_v46 = vrot.slane %v6119_v12, 1  ;;  %v6125_v8 = vrot.slane %v6124_v4, 2  ;;  %v6137_v11 = vrot.slane %v6136_v63, 4  ;;  %v6159_v31 = vsel %vm6158_vm5, %v6107_v42, %v6100_v49 }
 0xddd   : > { %v6093_v1 = vmul.f32 %v6085_v45, %v8304_v61  ;;  %v6112_v47 = vadd.f32 %v6111_v58, %v6110_v19  ;;  %v6131_v60 = vadd.f32 %v6130_v6, %v6129_v40 }
 0xdde   : > { %v6126_v62 = vadd.f32 %v6125_v8, %v6124_v4  ;;  %v6138_v5 = vadd.f32 %v6137_v11, %v6136_v63  ;;  %v6121_v61 = vadd.f32 %v6120_v46, %v6119_v12 }
 0xddf   : > { %v6113_v24 = vrot.slane %v6112_v47, 1  ;;  %v6132_v26 = vrot.slane %v6131_v60, 2  ;;  %v6143_v55 = vsel %vm202_vm0, %v6093_v1, 0.0 }
 0xde0   : > { %v6144_v7 = vrot.slane %v6143_v55, 4  ;;  %v6127_v16 = vrot.slane %v6126_v62, 1  ;;  %v6139_v21 = vrot.slane %v6138_v5, 2 }
 0xde1   : > { %v6114_v51 = vadd.f32 %v6113_v24, %v6112_v47  ;;  %v6133_v54 = vadd.f32 %v6132_v26, %v6131_v60 }
 0xde2   : > { %v6145_v22 = vadd.f32 %v6144_v7, %v6143_v55  ;;  %v6128_v3 = vadd.f32 %v6127_v16, %v6126_v62  ;;  %v6140_v34 = vadd.f32 %v6139_v21, %v6138_v5 }
 0xde3   : > { %v6134_v30 = vrot.slane %v6133_v54, 1  ;;  %v6161_v32 = vsel %vm6160_vm6, %v6114_v51, %v6159_v31 }
 0xde4   : > { %v6146_v38 = vrot.slane %v6145_v22, 2  ;;  %v6163_v14 = vsel %vm6162_vm7, %v6121_v61, %v6161_v32  ;;  %v6141_v17 = vrot.slane %v6140_v34, 1 }
 0xde5   : > { %v6135_v44 = vadd.f32 %v6134_v30, %v6133_v54  ;;  %v6165_v9 = vsel %vm6164_vm8, %v6128_v3, %v6163_v14 }
 0xde6   : > { %v6147_v36 = vadd.f32 %v6146_v38, %v6145_v22  ;;  %v6142_v29 = vadd.f32 %v6141_v17, %v6140_v34 }
 0xde7   : > { %v6167_v27 = vsel %vm6166_vm9, %v6135_v44, %v6165_v9 }
 0xde8   : > { %v6148_v57 = vrot.slane %v6147_v36, 1  ;;  %v6169_v25 = vsel %vm6168_vm10, %v6142_v29, %v6167_v27 }
 0xdea   : > { %v6149_v13 = vadd.f32 %v6148_v57, %v6147_v36 }
 0xdec   : > { %v6171_v23 = vsel %vm6170_vm11, %v6149_v13, %v6169_v25 }
 0xded   : > { %6173 = vst.msk [vmem:[%s188_s7] sm:$0xff] %vm202_vm0, %v6171_v23 }
 0xdee   : > { %7197 = shalt.err (!%p7194_p1)
}
 0xdef   : > { %s7198_s5 = scalar_lea.hbm %s8383_s20, 128  ;;  %s7202_s30 = scalar_lea.hbm %s8430_s3, 384 }
 0xdf0   : > { %p7199_p3 = scmp.ne.s32.totalorder %s8383_s20, %s7198_s5  ;;  %p7203_p0 = scmp.lt.u32.totalorder %s8383_s20, %s8430_s3 }
 0xdf1   : > { %p7204_p2 = scmp.lt.u32.totalorder %s7202_s30, %s7198_s5  ;;  %p7206_p6 = scmp.lt.u32.totalorder %s7198_s5, %s8383_s20 }
 0xdf2   : > { %p7200_p4 = pnand %p7199_p3, %p8437_p10 }
 0xdf3   : > { %p7205_p7 = por %p7204_p2, %p7203_p0 }
 0xdf4   : > { %p7201_p5 = pneg %p7200_p4 }
 0xdf5   : > { %p7207_p11 = por %p7206_p6, %p7205_p7 }
 0xdf7   : > { %p7208_p12 = pnand %p7207_p11, %p7201_p5 }
 0xdf9   : > { %7211 = shalt.err (!%p7208_p12)
}
 0xdfa   : > { %6916 = dma.vmem_to_hbm [thread:$0]  (%p8437_p10), %s8385_s8, 128, %s8383_s20, %s6175_s22  }
 0xdfb PF: > { %p6927_p8 = scmp.ge.s32.totalorder %s7250_s15, 2  ;;  %s6200_s11 = sand.u32 1, %s7238_s12  }
 0xdfc   : > { %p8438_p9 = scmp.ne.s32.totalorder %s8435_s25, 0  ;;  %s6201_s4 = scalar_lea.sflag [#allocation4], %s6200_s11 }
 0xdfe   : > { %p6923_p13 = pnand %p6927_p8, %p8438_p9 }
 0xe00   : > { %7233 = dma.done.wait (!%p6923_p13), %s6201_s4, 128  }
 0xe01   : > { %7235 = vsyncadd (!%p6923_p13), %s6201_s4, 4294967168  ;;  %p16_p1 = scmp.ge.s32.totalorder %s7317_s18, 5   ;;  %s8439_s12 = smov %s7242_s13 }
 0xe02   : > { %s8440_s13 = smov %s7246_s14  ;;  %s8441_s14 = smov %s7329_s21 }
 0xe03   : > { %s8442_s15 = smov %s7317_s18  ;;  %18 = sbr.rel (!%p16_p1) target bundleno = 5 (0x5), region = 77 }
 0xe0a   :  { %6206 = vsyncpa [#allocation3], 1 }
 0xe0b   :  { %6208 = vsyncpa [#allocation3 + $0x1], 1 }
 0xe0c   :  { %6209 = vsyncpa [#allocation4], 1 }
 0xe0d   :  { %6211 = vsyncpa [#allocation4 + $0x1], 1 }

</bundles_post_ra>
